<compile_context>
chip_gen: v7x
topology: tpu7x:2x2x1
jax: 0.10.0
libtpu: 0.0.40
codegen_flags: <defaults>
</compile_context>

<pallas_src>
import jax
import jax.numpy as jnp
from jax.experimental import pallas as pl
from jax.experimental.pallas import tpu as pltpu

# ----------------------------- small config ---------------------------------
B, S, H = 2, 8, 32          # batch, seq, hidden_size
NH, HD = 2, 16              # heads, head_dim (NH*HD == H)
FF = 64                     # intermediate (FFN) size
L = 2                       # number of transformer layers
VOCAB = 100
MAXPOS = 16
TYPES = 2
CLS_HID = 512               # nn.Linear(hidden_size, 512)
NUM_LABELS = 12             # stand-in for sum(len(labels) for labels in LABELS.values())
OUT_PAD = 128               # lane-dense padded output width
LN_EPS = 1e-12
BS = B * S

VMEM_SPEC = pl.BlockSpec(memory_space=pltpu.MemorySpace.VMEM)


# --------------------------- fully fused kernel ------------------------------
def _fused_forward_kernel(
    ids_ref, mask_ref, block_ref,
    wemb_ref, femb_ref, emb_g_ref, emb_b_ref,
    wq_ref, bq_ref, wk_ref, bk_ref, wv_ref, bv_ref, wo_ref, bo_ref,
    ln1g_ref, ln1b_ref, w1_ref, b1_ref, w2_ref, b2_ref, ln2g_ref, ln2b_ref,
    poolw_ref, poolb_ref, clsw1_ref, clsb1_ref, clsw2_ref, clsb2_ref,
    o_ref,
):
    """Entire BERT-style forward + classifier head in one kernel."""
    f32 = jnp.float32
    bf16 = jnp.bfloat16

    def mm(a, b):
        # bf16 MXU operands (weights are already bf16 -> cast is a no-op),
        # f32 accumulation.
        return jnp.dot(a.astype(bf16), b.astype(bf16), preferred_element_type=f32)

    def mm_nt(a, b):
        # a[m,k] . b[n,k]^T without an explicit XLU transpose.
        return jax.lax.dot_general(
            a.astype(bf16), b.astype(bf16),
            dimension_numbers=(((1,), (1,)), ((), ())),
            preferred_element_type=f32)

    def layernorm(x, g, b):
        mu = jnp.mean(x, axis=-1, keepdims=True)
        var = jnp.mean(jnp.square(x - mu), axis=-1, keepdims=True)
        return (x - mu) * jax.lax.rsqrt(var + LN_EPS) * g + b

    # ----- embedding lookup fused in-kernel: one-hot @ word_emb on the MXU -----
    ids = ids_ref[...]                                               # [BS, 1] int32
    vocab_iota = jax.lax.broadcasted_iota(jnp.int32, (BS, VOCAB), 1)
    onehot = jnp.where(ids == vocab_iota, 1.0, 0.0).astype(bf16)     # [BS, VOCAB]
    x = (jnp.dot(onehot, wemb_ref[...], preferred_element_type=f32)
         + femb_ref[...])                                            # word + pos + type
    x = layernorm(x, emb_g_ref[...], emb_b_ref[...])                 # [BS, H] f32

    # ----- additive attention bias: block-diagonal (batch) + key padding -----
    key_bias = (1.0 - mask_ref[...]) * -10000.0                      # [1, BS]
    bias = block_ref[...] + key_bias                                 # [BS, BS]

    # ----- transformer layers (static unroll: L=2, NH=2) -----
    for l in range(L):
        attn = bo_ref[l]                                             # [1, H]
        for h in range(NH):
            w = l * NH + h
            # 1/sqrt(HD) already folded into wq/bq at prep time.
            q = mm(x, wq_ref[w]) + bq_ref[w]                         # [BS, HD]
            k = mm(x, wk_ref[w]) + bk_ref[w]                         # [BS, HD]
            v = mm(x, wv_ref[w]) + bv_ref[w]                         # [BS, HD]

            s = mm_nt(q, k) + bias                                   # [BS, BS]
            s_max = jnp.max(s, axis=-1, keepdims=True)
            e = jnp.exp(s - s_max)
            p = e * pl.reciprocal(jnp.sum(e, axis=-1, keepdims=True), approx=True)
            ctx = mm(p, v)                                           # [BS, HD]
            # output projection decomposed per head: ctx @ Wo == sum_h ctx_h @ Wo[h]
            attn = attn + mm(ctx, wo_ref[w])                         # [BS, H]

        x = layernorm(attn + x, ln1g_ref[l], ln1b_ref[l])

        # FFN
        # TODO(synk): HF BERT uses exact erf GELU; tanh-approx kept (robust Mosaic
        # lowering, stand-in weights anyway).
        hmid = jax.nn.gelu(mm(x, w1_ref[l]) + b1_ref[l])             # [BS, FF]
        ff = mm(hmid, w2_ref[l]) + b2_ref[l]                         # [BS, H]
        x = layernorm(ff + x, ln2g_ref[l], ln2b_ref[l])

    # ----- BERT pooler + classifier head, computed row-wise for ALL tokens -----
    # (CLS rows 0 and S are selected in the wrapper; avoids an in-kernel gather
    #  and keeps the output a dense [16, 128] tile.)
    pooled = jnp.tanh(mm(x, poolw_ref[...]) + poolb_ref[...])        # [BS, H]
    # TODO(synk): Dropout(0.1) is a no-op at inference; omitted intentionally.
    h1 = jnp.maximum(mm(pooled, clsw1_ref[...]) + clsb1_ref[...], 0.0)   # [BS, 512]
    logits = jax.nn.sigmoid(mm(h1, clsw2_ref[...]) + clsb2_ref[...])     # [BS, 128]
    o_ref[...] = logits.astype(o_ref.dtype)


# ------------------------------ parameters -----------------------------------
def init_params(key):
    keys = iter(jax.random.split(key, 64))

    def w(shape, scale=0.02):
        return (scale * jax.random.normal(next(keys), shape)).astype(jnp.float32)

    ones = lambda *s: jnp.ones(s, jnp.float32)

    return {
        "word_emb": w((VOCAB, H)),
        "pos_emb": w((MAXPOS, H)),
        "type_emb": w((TYPES, H)),
        "emb_ln_g": ones(1, H), "emb_ln_b": w((1, H)),
        "wq": w((L, H, H)), "bq": w((L, 1, H)),
        "wk": w((L, H, H)), "bk": w((L, 1, H)),
        "wv": w((L, H, H)), "bv": w((L, 1, H)),
        "wo": w((L, H, H)), "bo": w((L, 1, H)),
        "ln1_g": ones(L, 1, H), "ln1_b": w((L, 1, H)),
        "w1": w((L, H, FF)), "b1": w((L, 1, FF)),
        "w2": w((L, FF, H)), "b2": w((L, 1, H)),
        "ln2_g": ones(L, 1, H), "ln2_b": w((L, 1, H)),
        "pool_w": w((H, H)), "pool_b": w((1, H)),
        "cls_w1": w((H, CLS_HID)), "cls_b1": w((1, CLS_HID)),
        "cls_w2": w((CLS_HID, NUM_LABELS)), "cls_b2": w((NUM_LABELS,)),
    }


def prepare_params(p):
    """One-time preprocessing: bf16 pre-cast, per-head re-layout, scale folding,
    classifier padding, fixed (pos+type) embedding slab, block-diagonal bias."""
    scale = 1.0 / (HD ** 0.5)
    bf = lambda a: a.astype(jnp.bfloat16)

    def split_heads_w(wmat):     # (L, H, H) -> (L*NH, H, HD), head h = cols [h*HD:(h+1)*HD]
        return wmat.reshape(L, H, NH, HD).transpose(0, 2, 1, 3).reshape(L * NH, H, HD)

    def split_heads_b(bvec):     # (L, 1, H) -> (L*NH, 1, HD)
        return bvec.reshape(L, 1, NH, HD).transpose(0, 2, 1, 3).reshape(L * NH, 1, HD)

    wo_ph = p["wo"].reshape(L, NH, HD, H).reshape(L * NH, HD, H)

    fixed_emb = (jnp.tile(p["pos_emb"][:S], (B, 1))
                 + p["type_emb"][0][None, :]).astype(jnp.float32)    # [BS, H]
    block_bias = ((1.0 - jnp.kron(jnp.eye(B, dtype=jnp.float32),
                                  jnp.ones((S, S), jnp.float32))) * -10000.0)  # [BS, BS]

    cls_w2p = jnp.pad(p["cls_w2"], ((0, 0), (0, OUT_PAD - NUM_LABELS)))
    cls_b2p = jnp.pad(p["cls_b2"], (0, OUT_PAD - NUM_LABELS)).reshape(1, OUT_PAD)

    return (
        block_bias,
        bf(p["word_emb"]), fixed_emb,
        p["emb_ln_g"], p["emb_ln_b"],
        bf(split_heads_w(p["wq"]) * scale), split_heads_b(p["bq"]) * scale,
        bf(split_heads_w(p["wk"])), split_heads_b(p["bk"]),
        bf(split_heads_w(p["wv"])), split_heads_b(p["bv"]),
        bf(wo_ph), p["bo"],
        p["ln1_g"], p["ln1_b"],
        bf(p["w1"]), p["b1"], bf(p["w2"]), p["b2"],
        p["ln2_g"], p["ln2_b"],
        bf(p["pool_w"]), p["pool_b"],
        bf(p["cls_w1"]), p["cls_b1"],
        bf(cls_w2p), cls_b2p,
    )


# -------------------------------- forward ------------------------------------
def forward(static_args, input_ids, attention_mask):
    b, s = input_ids.shape
    ids2 = input_ids.reshape(b * s, 1).astype(jnp.int32)
    mask2 = attention_mask.reshape(1, b * s).astype(jnp.float32)

    out = pl.pallas_call(
        _fused_forward_kernel,
        out_shape=jax.ShapeDtypeStruct((b * s, OUT_PAD), jnp.float32),
        in_specs=[VMEM_SPEC] * (2 + len(static_args)),
        out_specs=VMEM_SPEC,
    )(ids2, mask2, *static_args)

    # CLS rows (0, S, 2S, ...) and real label columns.
    return out[::s, :NUM_LABELS]                                     # [B, NUM_LABELS] in (0, 1)


# ------------------------- pure-JAX reference (f32) --------------------------
def forward_ref(p, input_ids, attention_mask):
    b, s = input_ids.shape

    def ln(x, g, bb):
        mu = x.mean(-1, keepdims=True)
        var = jnp.square(x - mu).mean(-1, keepdims=True)
        return (x - mu) / jnp.sqrt(var + LN_EPS) * g + bb

    x = (p["word_emb"][input_ids] + p["pos_emb"][None, :s, :]
         + p["type_emb"][0][None, None, :])
    x = ln(x, p["emb_ln_g"], p["emb_ln_b"])
    add_mask = (1.0 - attention_mask.astype(jnp.float32))[:, None, None, :] * -10000.0
    scale = 1.0 / (HD ** 0.5)
    for l in range(L):
        q = x @ p["wq"][l] + p["bq"][l]
        k = x @ p["wk"][l] + p["bk"][l]
        v = x @ p["wv"][l] + p["bv"][l]
        sh = lambda t: t.reshape(b, s, NH, HD).transpose(0, 2, 1, 3)
        sc = jnp.einsum("bhqd,bhkd->bhqk", sh(q), sh(k)) * scale + add_mask
        pr = jax.nn.softmax(sc, axis=-1)
        ctx = jnp.einsum("bhqk,bhkd->bhqd", pr, sh(v)).transpose(0, 2, 1, 3).reshape(b, s, H)
        x = ln(ctx @ p["wo"][l] + p["bo"][l] + x, p["ln1_g"][l], p["ln1_b"][l])
        hmid = jax.nn.gelu(x @ p["w1"][l] + p["b1"][l])
        x = ln(hmid @ p["w2"][l] + p["b2"][l] + x, p["ln2_g"][l], p["ln2_b"][l])
    pooled = jnp.tanh(x[:, 0, :] @ p["pool_w"] + p["pool_b"])
    h1 = jax.nn.relu(pooled @ p["cls_w1"] + p["cls_b1"])
    return jax.nn.sigmoid(h1 @ p["cls_w2"] + p["cls_b2"])


# --------------------------------- main ---------------------------------------
if __name__ == "__main__":
    key = jax.random.PRNGKey(0)
    pkey, ikey = jax.random.split(key)

    params = init_params(pkey)
    static_args = prepare_params(params)     # one-time weight preprocessing

    input_ids = jax.random.randint(ikey, (B, S), 0, VOCAB, dtype=jnp.int32)
    attention_mask = jnp.array([[1] * S, [1] * (S - 2) + [0] * 2], dtype=jnp.int32)

    fwd = jax.jit(forward)
    logits = jax.block_until_ready(fwd(static_args, input_ids, attention_mask))

    assert logits.shape == (B, NUM_LABELS), logits.shape
    assert bool(jnp.all(jnp.isfinite(logits)))
    assert bool(jnp.all((logits >= 0.0) & (logits <= 1.0)))

    ref = forward_ref(params, input_ids, attention_mask)
    max_diff = float(jnp.max(jnp.abs(logits - ref)))
    assert max_diff < 5e-2, f"max |pallas - ref| = {max_diff}"

    print("KERNEL_OK")
</pallas_src>

<mosaic_0001>
module attributes {stable_mosaic.version = 11 : i64} {
  func.func @_fused_forward_kernel(%arg0: memref<16x1xi32, #tpu.memory_space<vmem>>, %arg1: memref<1x16xf32, #tpu.memory_space<vmem>>, %arg2: memref<16x16xf32, #tpu.memory_space<vmem>>, %arg3: memref<100x32xbf16, #tpu.memory_space<vmem>>, %arg4: memref<16x32xf32, #tpu.memory_space<vmem>>, %arg5: memref<1x32xf32, #tpu.memory_space<vmem>>, %arg6: memref<1x32xf32, #tpu.memory_space<vmem>>, %arg7: memref<4x32x16xbf16, #tpu.memory_space<vmem>>, %arg8: memref<4x1x16xf32, #tpu.memory_space<vmem>>, %arg9: memref<4x32x16xbf16, #tpu.memory_space<vmem>>, %arg10: memref<4x1x16xf32, #tpu.memory_space<vmem>>, %arg11: memref<4x32x16xbf16, #tpu.memory_space<vmem>>, %arg12: memref<4x1x16xf32, #tpu.memory_space<vmem>>, %arg13: memref<4x16x32xbf16, #tpu.memory_space<vmem>>, %arg14: memref<2x1x32xf32, #tpu.memory_space<vmem>>, %arg15: memref<2x1x32xf32, #tpu.memory_space<vmem>>, %arg16: memref<2x1x32xf32, #tpu.memory_space<vmem>>, %arg17: memref<2x32x64xbf16, #tpu.memory_space<vmem>>, %arg18: memref<2x1x64xf32, #tpu.memory_space<vmem>>, %arg19: memref<2x64x32xbf16, #tpu.memory_space<vmem>>, %arg20: memref<2x1x32xf32, #tpu.memory_space<vmem>>, %arg21: memref<2x1x32xf32, #tpu.memory_space<vmem>>, %arg22: memref<2x1x32xf32, #tpu.memory_space<vmem>>, %arg23: memref<32x32xbf16, #tpu.memory_space<vmem>>, %arg24: memref<1x32xf32, #tpu.memory_space<vmem>>, %arg25: memref<32x512xbf16, #tpu.memory_space<vmem>>, %arg26: memref<1x512xf32, #tpu.memory_space<vmem>>, %arg27: memref<512x128xbf16, #tpu.memory_space<vmem>>, %arg28: memref<1x128xf32, #tpu.memory_space<vmem>>, %arg29: memref<16x128xf32, #tpu.memory_space<vmem>>) attributes {dimension_semantics = [], scalar_prefetch = 0 : i64, scratch_operands = 0 : i64, tpu.core_type = #tpu.core_type<tc>} {
    %c0 = arith.constant 0 : index
    %c0_0 = arith.constant 0 : index
    %0 = vector.load %arg0[%c0, %c0_0] : memref<16x1xi32, #tpu.memory_space<vmem>>, vector<16x1xi32>
    %1 = tpu.iota {dimensions = array<i32: 1>} : vector<16x100xi32>
    %2 = vector.broadcast %0 : vector<16x1xi32> to vector<16x100xi32>
    %3 = arith.cmpi eq, %2, %1 : vector<16x100xi32>
    %cst = arith.constant 1.000000e+00 : f32
    %cst_1 = arith.constant 0.000000e+00 : f32
    %4 = vector.broadcast %cst : f32 to vector<16x100xf32>
    %5 = vector.broadcast %cst_1 : f32 to vector<16x100xf32>
    %6 = arith.select %3, %4, %5 : vector<16x100xi1>, vector<16x100xf32>
    %7 = arith.truncf %6 : vector<16x100xf32> to vector<16x100xbf16>
    %c0_2 = arith.constant 0 : index
    %c0_3 = arith.constant 0 : index
    %8 = vector.load %arg3[%c0_2, %c0_3] : memref<100x32xbf16, #tpu.memory_space<vmem>>, vector<100x32xbf16>
    %cst_4 = arith.constant dense<0.000000e+00> : vector<16x32xf32>
    %9 = tpu.matmul %7, %8, %cst_4 {dimension_numbers = #tpu.dot_dimension_numbers<[1], [0], [0], [1], [0, 0, 1, 1], [], []>} : vector<16x100xbf16>, vector<100x32xbf16>, vector<16x32xf32> -> vector<16x32xf32>
    %c0_5 = arith.constant 0 : index
    %c0_6 = arith.constant 0 : index
    %10 = vector.load %arg4[%c0_5, %c0_6] : memref<16x32xf32, #tpu.memory_space<vmem>>, vector<16x32xf32>
    %11 = arith.addf %9, %10 : vector<16x32xf32>
    %c0_7 = arith.constant 0 : index
    %c0_8 = arith.constant 0 : index
    %12 = vector.load %arg5[%c0_7, %c0_8] : memref<1x32xf32, #tpu.memory_space<vmem>>, vector<1x32xf32>
    %c0_9 = arith.constant 0 : index
    %c0_10 = arith.constant 0 : index
    %13 = vector.load %arg6[%c0_9, %c0_10] : memref<1x32xf32, #tpu.memory_space<vmem>>, vector<1x32xf32>
    %cst_11 = arith.constant dense<0.000000e+00> : vector<16xf32>
    %14 = vector.multi_reduction <add>, %11, %cst_11 [1] : vector<16x32xf32> to vector<16xf32>
    %15 = vector.shape_cast %14 : vector<16xf32> to vector<16x1xf32>
    %cst_12 = arith.constant 3.200000e+01 : f32
    %16 = vector.broadcast %cst_12 : f32 to vector<16x1xf32>
    %17 = arith.divf %15, %16 : vector<16x1xf32>
    %18 = vector.broadcast %17 : vector<16x1xf32> to vector<16x32xf32>
    %19 = arith.subf %11, %18 : vector<16x32xf32>
    %20 = arith.mulf %19, %19 : vector<16x32xf32>
    %cst_13 = arith.constant dense<0.000000e+00> : vector<16xf32>
    %21 = vector.multi_reduction <add>, %20, %cst_13 [1] : vector<16x32xf32> to vector<16xf32>
    %22 = vector.shape_cast %21 : vector<16xf32> to vector<16x1xf32>
    %cst_14 = arith.constant 3.200000e+01 : f32
    %23 = vector.broadcast %cst_14 : f32 to vector<16x1xf32>
    %24 = arith.divf %22, %23 : vector<16x1xf32>
    %25 = vector.broadcast %17 : vector<16x1xf32> to vector<16x32xf32>
    %26 = arith.subf %11, %25 : vector<16x32xf32>
    %cst_15 = arith.constant 9.99999996E-13 : f32
    %27 = vector.broadcast %cst_15 : f32 to vector<16x1xf32>
    %28 = arith.addf %24, %27 : vector<16x1xf32>
    %29 = math.rsqrt %28 : vector<16x1xf32>
    %30 = vector.broadcast %29 : vector<16x1xf32> to vector<16x32xf32>
    %31 = arith.mulf %26, %30 : vector<16x32xf32>
    %32 = vector.broadcast %12 : vector<1x32xf32> to vector<16x32xf32>
    %33 = arith.mulf %31, %32 : vector<16x32xf32>
    %34 = vector.broadcast %13 : vector<1x32xf32> to vector<16x32xf32>
    %35 = arith.addf %33, %34 : vector<16x32xf32>
    %c0_16 = arith.constant 0 : index
    %c0_17 = arith.constant 0 : index
    %36 = vector.load %arg1[%c0_16, %c0_17] : memref<1x16xf32, #tpu.memory_space<vmem>>, vector<1x16xf32>
    %cst_18 = arith.constant 1.000000e+00 : f32
    %37 = vector.broadcast %cst_18 : f32 to vector<1x16xf32>
    %38 = arith.subf %37, %36 : vector<1x16xf32>
    %cst_19 = arith.constant -1.000000e+04 : f32
    %39 = vector.broadcast %cst_19 : f32 to vector<1x16xf32>
    %40 = arith.mulf %38, %39 : vector<1x16xf32>
    %c0_20 = arith.constant 0 : index
    %c0_21 = arith.constant 0 : index
    %41 = vector.load %arg2[%c0_20, %c0_21] : memref<16x16xf32, #tpu.memory_space<vmem>>, vector<16x16xf32>
    %42 = vector.broadcast %40 : vector<1x16xf32> to vector<16x16xf32>
    %43 = arith.addf %41, %42 : vector<16x16xf32>
    %c0_22 = arith.constant 0 : index
    %c0_23 = arith.constant 0 : index
    %c0_24 = arith.constant 0 : index
    %44 = vector.load %arg14[%c0_22, %c0_23, %c0_24] : memref<2x1x32xf32, #tpu.memory_space<vmem>>, vector<1x1x32xf32>
    %45 = vector.shape_cast %44 : vector<1x1x32xf32> to vector<1x32xf32>
    %c0_25 = arith.constant 0 : index
    %c0_26 = arith.constant 0 : index
    %c0_27 = arith.constant 0 : index
    %46 = vector.load %arg7[%c0_25, %c0_26, %c0_27] : memref<4x32x16xbf16, #tpu.memory_space<vmem>>, vector<1x32x16xbf16>
    %47 = vector.shape_cast %46 : vector<1x32x16xbf16> to vector<32x16xbf16>
    %48 = arith.truncf %35 : vector<16x32xf32> to vector<16x32xbf16>
    %cst_28 = arith.constant dense<0.000000e+00> : vector<16x16xf32>
    %49 = tpu.matmul %48, %47, %cst_28 {dimension_numbers = #tpu.dot_dimension_numbers<[1], [0], [0], [1], [0, 0, 1, 1], [], []>} : vector<16x32xbf16>, vector<32x16xbf16>, vector<16x16xf32> -> vector<16x16xf32>
    %c0_29 = arith.constant 0 : index
    %c0_30 = arith.constant 0 : index
    %c0_31 = arith.constant 0 : index
    %50 = vector.load %arg8[%c0_29, %c0_30, %c0_31] : memref<4x1x16xf32, #tpu.memory_space<vmem>>, vector<1x1x16xf32>
    %51 = vector.shape_cast %50 : vector<1x1x16xf32> to vector<1x16xf32>
    %52 = vector.broadcast %51 : vector<1x16xf32> to vector<16x16xf32>
    %53 = arith.addf %49, %52 : vector<16x16xf32>
    %c0_32 = arith.constant 0 : index
    %c0_33 = arith.constant 0 : index
    %c0_34 = arith.constant 0 : index
    %54 = vector.load %arg9[%c0_32, %c0_33, %c0_34] : memref<4x32x16xbf16, #tpu.memory_space<vmem>>, vector<1x32x16xbf16>
    %55 = vector.shape_cast %54 : vector<1x32x16xbf16> to vector<32x16xbf16>
    %56 = arith.truncf %35 : vector<16x32xf32> to vector<16x32xbf16>
    %cst_35 = arith.constant dense<0.000000e+00> : vector<16x16xf32>
    %57 = tpu.matmul %56, %55, %cst_35 {dimension_numbers = #tpu.dot_dimension_numbers<[1], [0], [0], [1], [0, 0, 1, 1], [], []>} : vector<16x32xbf16>, vector<32x16xbf16>, vector<16x16xf32> -> vector<16x16xf32>
    %c0_36 = arith.constant 0 : index
    %c0_37 = arith.constant 0 : index
    %c0_38 = arith.constant 0 : index
    %58 = vector.load %arg10[%c0_36, %c0_37, %c0_38] : memref<4x1x16xf32, #tpu.memory_space<vmem>>, vector<1x1x16xf32>
    %59 = vector.shape_cast %58 : vector<1x1x16xf32> to vector<1x16xf32>
    %60 = vector.broadcast %59 : vector<1x16xf32> to vector<16x16xf32>
    %61 = arith.addf %57, %60 : vector<16x16xf32>
    %c0_39 = arith.constant 0 : index
    %c0_40 = arith.constant 0 : index
    %c0_41 = arith.constant 0 : index
    %62 = vector.load %arg11[%c0_39, %c0_40, %c0_41] : memref<4x32x16xbf16, #tpu.memory_space<vmem>>, vector<1x32x16xbf16>
    %63 = vector.shape_cast %62 : vector<1x32x16xbf16> to vector<32x16xbf16>
    %64 = arith.truncf %35 : vector<16x32xf32> to vector<16x32xbf16>
    %cst_42 = arith.constant dense<0.000000e+00> : vector<16x16xf32>
    %65 = tpu.matmul %64, %63, %cst_42 {dimension_numbers = #tpu.dot_dimension_numbers<[1], [0], [0], [1], [0, 0, 1, 1], [], []>} : vector<16x32xbf16>, vector<32x16xbf16>, vector<16x16xf32> -> vector<16x16xf32>
    %c0_43 = arith.constant 0 : index
    %c0_44 = arith.constant 0 : index
    %c0_45 = arith.constant 0 : index
    %66 = vector.load %arg12[%c0_43, %c0_44, %c0_45] : memref<4x1x16xf32, #tpu.memory_space<vmem>>, vector<1x1x16xf32>
    %67 = vector.shape_cast %66 : vector<1x1x16xf32> to vector<1x16xf32>
    %68 = vector.broadcast %67 : vector<1x16xf32> to vector<16x16xf32>
    %69 = arith.addf %65, %68 : vector<16x16xf32>
    %70 = arith.truncf %53 : vector<16x16xf32> to vector<16x16xbf16>
    %71 = arith.truncf %61 : vector<16x16xf32> to vector<16x16xbf16>
    %cst_46 = arith.constant dense<0.000000e+00> : vector<16x16xf32>
    %72 = tpu.matmul %70, %71, %cst_46 {dimension_numbers = #tpu.dot_dimension_numbers<[1], [1], [0], [0], [0, 0, 1, 0], [], []>} : vector<16x16xbf16>, vector<16x16xbf16>, vector<16x16xf32> -> vector<16x16xf32>
    %73 = arith.addf %72, %43 : vector<16x16xf32>
    %cst_47 = arith.constant dense<0xFF800000> : vector<16xf32>
    %74 = vector.multi_reduction <maximumf>, %73, %cst_47 [1] : vector<16x16xf32> to vector<16xf32>
    %75 = vector.shape_cast %74 : vector<16xf32> to vector<16x1xf32>
    %76 = vector.broadcast %75 : vector<16x1xf32> to vector<16x16xf32>
    %77 = arith.subf %73, %76 : vector<16x16xf32>
    %78 = math.exp %77 : vector<16x16xf32>
    %cst_48 = arith.constant dense<0.000000e+00> : vector<16xf32>
    %79 = vector.multi_reduction <add>, %78, %cst_48 [1] : vector<16x16xf32> to vector<16xf32>
    %80 = vector.shape_cast %79 : vector<16xf32> to vector<16x1xf32>
    %81 = tpu.reciprocal %80 {approx = true} : vector<16x1xf32> -> vector<16x1xf32>
    %82 = vector.broadcast %81 : vector<16x1xf32> to vector<16x16xf32>
    %83 = arith.mulf %78, %82 : vector<16x16xf32>
    %84 = arith.truncf %83 : vector<16x16xf32> to vector<16x16xbf16>
    %85 = arith.truncf %69 : vector<16x16xf32> to vector<16x16xbf16>
    %cst_49 = arith.constant dense<0.000000e+00> : vector<16x16xf32>
    %86 = tpu.matmul %84, %85, %cst_49 {dimension_numbers = #tpu.dot_dimension_numbers<[1], [0], [0], [1], [0, 0, 1, 1], [], []>} : vector<16x16xbf16>, vector<16x16xbf16>, vector<16x16xf32> -> vector<16x16xf32>
    %c0_50 = arith.constant 0 : index
    %c0_51 = arith.constant 0 : index
    %c0_52 = arith.constant 0 : index
    %87 = vector.load %arg13[%c0_50, %c0_51, %c0_52] : memref<4x16x32xbf16, #tpu.memory_space<vmem>>, vector<1x16x32xbf16>
    %88 = vector.shape_cast %87 : vector<1x16x32xbf16> to vector<16x32xbf16>
    %89 = arith.truncf %86 : vector<16x16xf32> to vector<16x16xbf16>
    %cst_53 = arith.constant dense<0.000000e+00> : vector<16x32xf32>
    %90 = tpu.matmul %89, %88, %cst_53 {dimension_numbers = #tpu.dot_dimension_numbers<[1], [0], [0], [1], [0, 0, 1, 1], [], []>} : vector<16x16xbf16>, vector<16x32xbf16>, vector<16x32xf32> -> vector<16x32xf32>
    %91 = vector.broadcast %45 : vector<1x32xf32> to vector<16x32xf32>
    %92 = arith.addf %91, %90 : vector<16x32xf32>
    %c1 = arith.constant 1 : index
    %c0_54 = arith.constant 0 : index
    %c0_55 = arith.constant 0 : index
    %93 = vector.load %arg7[%c1, %c0_54, %c0_55] : memref<4x32x16xbf16, #tpu.memory_space<vmem>>, vector<1x32x16xbf16>
    %94 = vector.shape_cast %93 : vector<1x32x16xbf16> to vector<32x16xbf16>
    %95 = arith.truncf %35 : vector<16x32xf32> to vector<16x32xbf16>
    %cst_56 = arith.constant dense<0.000000e+00> : vector<16x16xf32>
    %96 = tpu.matmul %95, %94, %cst_56 {dimension_numbers = #tpu.dot_dimension_numbers<[1], [0], [0], [1], [0, 0, 1, 1], [], []>} : vector<16x32xbf16>, vector<32x16xbf16>, vector<16x16xf32> -> vector<16x16xf32>
    %c1_57 = arith.constant 1 : index
    %c0_58 = arith.constant 0 : index
    %c0_59 = arith.constant 0 : index
    %97 = vector.load %arg8[%c1_57, %c0_58, %c0_59] : memref<4x1x16xf32, #tpu.memory_space<vmem>>, vector<1x1x16xf32>
    %98 = vector.shape_cast %97 : vector<1x1x16xf32> to vector<1x16xf32>
    %99 = vector.broadcast %98 : vector<1x16xf32> to vector<16x16xf32>
    %100 = arith.addf %96, %99 : vector<16x16xf32>
    %c1_60 = arith.constant 1 : index
    %c0_61 = arith.constant 0 : index
    %c0_62 = arith.constant 0 : index
    %101 = vector.load %arg9[%c1_60, %c0_61, %c0_62] : memref<4x32x16xbf16, #tpu.memory_space<vmem>>, vector<1x32x16xbf16>
    %102 = vector.shape_cast %101 : vector<1x32x16xbf16> to vector<32x16xbf16>
    %103 = arith.truncf %35 : vector<16x32xf32> to vector<16x32xbf16>
    %cst_63 = arith.constant dense<0.000000e+00> : vector<16x16xf32>
    %104 = tpu.matmul %103, %102, %cst_63 {dimension_numbers = #tpu.dot_dimension_numbers<[1], [0], [0], [1], [0, 0, 1, 1], [], []>} : vector<16x32xbf16>, vector<32x16xbf16>, vector<16x16xf32> -> vector<16x16xf32>
    %c1_64 = arith.constant 1 : index
    %c0_65 = arith.constant 0 : index
    %c0_66 = arith.constant 0 : index
    %105 = vector.load %arg10[%c1_64, %c0_65, %c0_66] : memref<4x1x16xf32, #tpu.memory_space<vmem>>, vector<1x1x16xf32>
    %106 = vector.shape_cast %105 : vector<1x1x16xf32> to vector<1x16xf32>
    %107 = vector.broadcast %106 : vector<1x16xf32> to vector<16x16xf32>
    %108 = arith.addf %104, %107 : vector<16x16xf32>
    %c1_67 = arith.constant 1 : index
    %c0_68 = arith.constant 0 : index
    %c0_69 = arith.constant 0 : index
    %109 = vector.load %arg11[%c1_67, %c0_68, %c0_69] : memref<4x32x16xbf16, #tpu.memory_space<vmem>>, vector<1x32x16xbf16>
    %110 = vector.shape_cast %109 : vector<1x32x16xbf16> to vector<32x16xbf16>
    %111 = arith.truncf %35 : vector<16x32xf32> to vector<16x32xbf16>
    %cst_70 = arith.constant dense<0.000000e+00> : vector<16x16xf32>
    %112 = tpu.matmul %111, %110, %cst_70 {dimension_numbers = #tpu.dot_dimension_numbers<[1], [0], [0], [1], [0, 0, 1, 1], [], []>} : vector<16x32xbf16>, vector<32x16xbf16>, vector<16x16xf32> -> vector<16x16xf32>
    %c1_71 = arith.constant 1 : index
    %c0_72 = arith.constant 0 : index
    %c0_73 = arith.constant 0 : index
    %113 = vector.load %arg12[%c1_71, %c0_72, %c0_73] : memref<4x1x16xf32, #tpu.memory_space<vmem>>, vector<1x1x16xf32>
    %114 = vector.shape_cast %113 : vector<1x1x16xf32> to vector<1x16xf32>
    %115 = vector.broadcast %114 : vector<1x16xf32> to vector<16x16xf32>
    %116 = arith.addf %112, %115 : vector<16x16xf32>
    %117 = arith.truncf %100 : vector<16x16xf32> to vector<16x16xbf16>
    %118 = arith.truncf %108 : vector<16x16xf32> to vector<16x16xbf16>
    %cst_74 = arith.constant dense<0.000000e+00> : vector<16x16xf32>
    %119 = tpu.matmul %117, %118, %cst_74 {dimension_numbers = #tpu.dot_dimension_numbers<[1], [1], [0], [0], [0, 0, 1, 0], [], []>} : vector<16x16xbf16>, vector<16x16xbf16>, vector<16x16xf32> -> vector<16x16xf32>
    %120 = arith.addf %119, %43 : vector<16x16xf32>
    %cst_75 = arith.constant dense<0xFF800000> : vector<16xf32>
    %121 = vector.multi_reduction <maximumf>, %120, %cst_75 [1] : vector<16x16xf32> to vector<16xf32>
    %122 = vector.shape_cast %121 : vector<16xf32> to vector<16x1xf32>
    %123 = vector.broadcast %122 : vector<16x1xf32> to vector<16x16xf32>
    %124 = arith.subf %120, %123 : vector<16x16xf32>
    %125 = math.exp %124 : vector<16x16xf32>
    %cst_76 = arith.constant dense<0.000000e+00> : vector<16xf32>
    %126 = vector.multi_reduction <add>, %125, %cst_76 [1] : vector<16x16xf32> to vector<16xf32>
    %127 = vector.shape_cast %126 : vector<16xf32> to vector<16x1xf32>
    %128 = tpu.reciprocal %127 {approx = true} : vector<16x1xf32> -> vector<16x1xf32>
    %129 = vector.broadcast %128 : vector<16x1xf32> to vector<16x16xf32>
    %130 = arith.mulf %125, %129 : vector<16x16xf32>
    %131 = arith.truncf %130 : vector<16x16xf32> to vector<16x16xbf16>
    %132 = arith.truncf %116 : vector<16x16xf32> to vector<16x16xbf16>
    %cst_77 = arith.constant dense<0.000000e+00> : vector<16x16xf32>
    %133 = tpu.matmul %131, %132, %cst_77 {dimension_numbers = #tpu.dot_dimension_numbers<[1], [0], [0], [1], [0, 0, 1, 1], [], []>} : vector<16x16xbf16>, vector<16x16xbf16>, vector<16x16xf32> -> vector<16x16xf32>
    %c1_78 = arith.constant 1 : index
    %c0_79 = arith.constant 0 : index
    %c0_80 = arith.constant 0 : index
    %134 = vector.load %arg13[%c1_78, %c0_79, %c0_80] : memref<4x16x32xbf16, #tpu.memory_space<vmem>>, vector<1x16x32xbf16>
    %135 = vector.shape_cast %134 : vector<1x16x32xbf16> to vector<16x32xbf16>
    %136 = arith.truncf %133 : vector<16x16xf32> to vector<16x16xbf16>
    %cst_81 = arith.constant dense<0.000000e+00> : vector<16x32xf32>
    %137 = tpu.matmul %136, %135, %cst_81 {dimension_numbers = #tpu.dot_dimension_numbers<[1], [0], [0], [1], [0, 0, 1, 1], [], []>} : vector<16x16xbf16>, vector<16x32xbf16>, vector<16x32xf32> -> vector<16x32xf32>
    %138 = arith.addf %92, %137 : vector<16x32xf32>
    %139 = arith.addf %138, %35 : vector<16x32xf32>
    %c0_82 = arith.constant 0 : index
    %c0_83 = arith.constant 0 : index
    %c0_84 = arith.constant 0 : index
    %140 = vector.load %arg15[%c0_82, %c0_83, %c0_84] : memref<2x1x32xf32, #tpu.memory_space<vmem>>, vector<1x1x32xf32>
    %141 = vector.shape_cast %140 : vector<1x1x32xf32> to vector<1x32xf32>
    %c0_85 = arith.constant 0 : index
    %c0_86 = arith.constant 0 : index
    %c0_87 = arith.constant 0 : index
    %142 = vector.load %arg16[%c0_85, %c0_86, %c0_87] : memref<2x1x32xf32, #tpu.memory_space<vmem>>, vector<1x1x32xf32>
    %143 = vector.shape_cast %142 : vector<1x1x32xf32> to vector<1x32xf32>
    %cst_88 = arith.constant dense<0.000000e+00> : vector<16xf32>
    %144 = vector.multi_reduction <add>, %139, %cst_88 [1] : vector<16x32xf32> to vector<16xf32>
    %145 = vector.shape_cast %144 : vector<16xf32> to vector<16x1xf32>
    %cst_89 = arith.constant 3.200000e+01 : f32
    %146 = vector.broadcast %cst_89 : f32 to vector<16x1xf32>
    %147 = arith.divf %145, %146 : vector<16x1xf32>
    %148 = vector.broadcast %147 : vector<16x1xf32> to vector<16x32xf32>
    %149 = arith.subf %139, %148 : vector<16x32xf32>
    %150 = arith.mulf %149, %149 : vector<16x32xf32>
    %cst_90 = arith.constant dense<0.000000e+00> : vector<16xf32>
    %151 = vector.multi_reduction <add>, %150, %cst_90 [1] : vector<16x32xf32> to vector<16xf32>
    %152 = vector.shape_cast %151 : vector<16xf32> to vector<16x1xf32>
    %cst_91 = arith.constant 3.200000e+01 : f32
    %153 = vector.broadcast %cst_91 : f32 to vector<16x1xf32>
    %154 = arith.divf %152, %153 : vector<16x1xf32>
    %155 = vector.broadcast %147 : vector<16x1xf32> to vector<16x32xf32>
    %156 = arith.subf %139, %155 : vector<16x32xf32>
    %cst_92 = arith.constant 9.99999996E-13 : f32
    %157 = vector.broadcast %cst_92 : f32 to vector<16x1xf32>
    %158 = arith.addf %154, %157 : vector<16x1xf32>
    %159 = math.rsqrt %158 : vector<16x1xf32>
    %160 = vector.broadcast %159 : vector<16x1xf32> to vector<16x32xf32>
    %161 = arith.mulf %156, %160 : vector<16x32xf32>
    %162 = vector.broadcast %141 : vector<1x32xf32> to vector<16x32xf32>
    %163 = arith.mulf %161, %162 : vector<16x32xf32>
    %164 = vector.broadcast %143 : vector<1x32xf32> to vector<16x32xf32>
    %165 = arith.addf %163, %164 : vector<16x32xf32>
    %c0_93 = arith.constant 0 : index
    %c0_94 = arith.constant 0 : index
    %c0_95 = arith.constant 0 : index
    %166 = vector.load %arg17[%c0_93, %c0_94, %c0_95] : memref<2x32x64xbf16, #tpu.memory_space<vmem>>, vector<1x32x64xbf16>
    %167 = vector.shape_cast %166 : vector<1x32x64xbf16> to vector<32x64xbf16>
    %168 = arith.truncf %165 : vector<16x32xf32> to vector<16x32xbf16>
    %cst_96 = arith.constant dense<0.000000e+00> : vector<16x64xf32>
    %169 = tpu.matmul %168, %167, %cst_96 {dimension_numbers = #tpu.dot_dimension_numbers<[1], [0], [0], [1], [0, 0, 1, 1], [], []>} : vector<16x32xbf16>, vector<32x64xbf16>, vector<16x64xf32> -> vector<16x64xf32>
    %c0_97 = arith.constant 0 : index
    %c0_98 = arith.constant 0 : index
    %c0_99 = arith.constant 0 : index
    %170 = vector.load %arg18[%c0_97, %c0_98, %c0_99] : memref<2x1x64xf32, #tpu.memory_space<vmem>>, vector<1x1x64xf32>
    %171 = vector.shape_cast %170 : vector<1x1x64xf32> to vector<1x64xf32>
    %172 = vector.broadcast %171 : vector<1x64xf32> to vector<16x64xf32>
    %173 = arith.addf %169, %172 : vector<16x64xf32>
    %174 = arith.mulf %173, %173 : vector<16x64xf32>
    %175 = arith.mulf %173, %174 : vector<16x64xf32>
    %cst_100 = arith.constant 4.471500e-02 : f32
    %176 = vector.broadcast %cst_100 : f32 to vector<16x64xf32>
    %177 = arith.mulf %176, %175 : vector<16x64xf32>
    %178 = arith.addf %173, %177 : vector<16x64xf32>
    %cst_101 = arith.constant 0.797884583 : f32
    %179 = vector.broadcast %cst_101 : f32 to vector<16x64xf32>
    %180 = arith.mulf %179, %178 : vector<16x64xf32>
    %181 = math.tanh %180 : vector<16x64xf32>
    %cst_102 = arith.constant 1.000000e+00 : f32
    %182 = vector.broadcast %cst_102 : f32 to vector<16x64xf32>
    %183 = arith.addf %182, %181 : vector<16x64xf32>
    %cst_103 = arith.constant 5.000000e-01 : f32
    %184 = vector.broadcast %cst_103 : f32 to vector<16x64xf32>
    %185 = arith.mulf %184, %183 : vector<16x64xf32>
    %186 = arith.mulf %173, %185 : vector<16x64xf32>
    %c0_104 = arith.constant 0 : index
    %c0_105 = arith.constant 0 : index
    %c0_106 = arith.constant 0 : index
    %187 = vector.load %arg19[%c0_104, %c0_105, %c0_106] : memref<2x64x32xbf16, #tpu.memory_space<vmem>>, vector<1x64x32xbf16>
    %188 = vector.shape_cast %187 : vector<1x64x32xbf16> to vector<64x32xbf16>
    %189 = arith.truncf %186 : vector<16x64xf32> to vector<16x64xbf16>
    %cst_107 = arith.constant dense<0.000000e+00> : vector<16x32xf32>
    %190 = tpu.matmul %189, %188, %cst_107 {dimension_numbers = #tpu.dot_dimension_numbers<[1], [0], [0], [1], [0, 0, 1, 1], [], []>} : vector<16x64xbf16>, vector<64x32xbf16>, vector<16x32xf32> -> vector<16x32xf32>
    %c0_108 = arith.constant 0 : index
    %c0_109 = arith.constant 0 : index
    %c0_110 = arith.constant 0 : index
    %191 = vector.load %arg20[%c0_108, %c0_109, %c0_110] : memref<2x1x32xf32, #tpu.memory_space<vmem>>, vector<1x1x32xf32>
    %192 = vector.shape_cast %191 : vector<1x1x32xf32> to vector<1x32xf32>
    %193 = vector.broadcast %192 : vector<1x32xf32> to vector<16x32xf32>
    %194 = arith.addf %190, %193 : vector<16x32xf32>
    %195 = arith.addf %194, %165 : vector<16x32xf32>
    %c0_111 = arith.constant 0 : index
    %c0_112 = arith.constant 0 : index
    %c0_113 = arith.constant 0 : index
    %196 = vector.load %arg21[%c0_111, %c0_112, %c0_113] : memref<2x1x32xf32, #tpu.memory_space<vmem>>, vector<1x1x32xf32>
    %197 = vector.shape_cast %196 : vector<1x1x32xf32> to vector<1x32xf32>
    %c0_114 = arith.constant 0 : index
    %c0_115 = arith.constant 0 : index
    %c0_116 = arith.constant 0 : index
    %198 = vector.load %arg22[%c0_114, %c0_115, %c0_116] : memref<2x1x32xf32, #tpu.memory_space<vmem>>, vector<1x1x32xf32>
    %199 = vector.shape_cast %198 : vector<1x1x32xf32> to vector<1x32xf32>
    %cst_117 = arith.constant dense<0.000000e+00> : vector<16xf32>
    %200 = vector.multi_reduction <add>, %195, %cst_117 [1] : vector<16x32xf32> to vector<16xf32>
    %201 = vector.shape_cast %200 : vector<16xf32> to vector<16x1xf32>
    %cst_118 = arith.constant 3.200000e+01 : f32
    %202 = vector.broadcast %cst_118 : f32 to vector<16x1xf32>
    %203 = arith.divf %201, %202 : vector<16x1xf32>
    %204 = vector.broadcast %203 : vector<16x1xf32> to vector<16x32xf32>
    %205 = arith.subf %195, %204 : vector<16x32xf32>
    %206 = arith.mulf %205, %205 : vector<16x32xf32>
    %cst_119 = arith.constant dense<0.000000e+00> : vector<16xf32>
    %207 = vector.multi_reduction <add>, %206, %cst_119 [1] : vector<16x32xf32> to vector<16xf32>
    %208 = vector.shape_cast %207 : vector<16xf32> to vector<16x1xf32>
    %cst_120 = arith.constant 3.200000e+01 : f32
    %209 = vector.broadcast %cst_120 : f32 to vector<16x1xf32>
    %210 = arith.divf %208, %209 : vector<16x1xf32>
    %211 = vector.broadcast %203 : vector<16x1xf32> to vector<16x32xf32>
    %212 = arith.subf %195, %211 : vector<16x32xf32>
    %cst_121 = arith.constant 9.99999996E-13 : f32
    %213 = vector.broadcast %cst_121 : f32 to vector<16x1xf32>
    %214 = arith.addf %210, %213 : vector<16x1xf32>
    %215 = math.rsqrt %214 : vector<16x1xf32>
    %216 = vector.broadcast %215 : vector<16x1xf32> to vector<16x32xf32>
    %217 = arith.mulf %212, %216 : vector<16x32xf32>
    %218 = vector.broadcast %197 : vector<1x32xf32> to vector<16x32xf32>
    %219 = arith.mulf %217, %218 : vector<16x32xf32>
    %220 = vector.broadcast %199 : vector<1x32xf32> to vector<16x32xf32>
    %221 = arith.addf %219, %220 : vector<16x32xf32>
    %c1_122 = arith.constant 1 : index
    %c0_123 = arith.constant 0 : index
    %c0_124 = arith.constant 0 : index
    %222 = vector.load %arg14[%c1_122, %c0_123, %c0_124] : memref<2x1x32xf32, #tpu.memory_space<vmem>>, vector<1x1x32xf32>
    %223 = vector.shape_cast %222 : vector<1x1x32xf32> to vector<1x32xf32>
    %c2 = arith.constant 2 : index
    %c0_125 = arith.constant 0 : index
    %c0_126 = arith.constant 0 : index
    %224 = vector.load %arg7[%c2, %c0_125, %c0_126] : memref<4x32x16xbf16, #tpu.memory_space<vmem>>, vector<1x32x16xbf16>
    %225 = vector.shape_cast %224 : vector<1x32x16xbf16> to vector<32x16xbf16>
    %226 = arith.truncf %221 : vector<16x32xf32> to vector<16x32xbf16>
    %cst_127 = arith.constant dense<0.000000e+00> : vector<16x16xf32>
    %227 = tpu.matmul %226, %225, %cst_127 {dimension_numbers = #tpu.dot_dimension_numbers<[1], [0], [0], [1], [0, 0, 1, 1], [], []>} : vector<16x32xbf16>, vector<32x16xbf16>, vector<16x16xf32> -> vector<16x16xf32>
    %c2_128 = arith.constant 2 : index
    %c0_129 = arith.constant 0 : index
    %c0_130 = arith.constant 0 : index
    %228 = vector.load %arg8[%c2_128, %c0_129, %c0_130] : memref<4x1x16xf32, #tpu.memory_space<vmem>>, vector<1x1x16xf32>
    %229 = vector.shape_cast %228 : vector<1x1x16xf32> to vector<1x16xf32>
    %230 = vector.broadcast %229 : vector<1x16xf32> to vector<16x16xf32>
    %231 = arith.addf %227, %230 : vector<16x16xf32>
    %c2_131 = arith.constant 2 : index
    %c0_132 = arith.constant 0 : index
    %c0_133 = arith.constant 0 : index
    %232 = vector.load %arg9[%c2_131, %c0_132, %c0_133] : memref<4x32x16xbf16, #tpu.memory_space<vmem>>, vector<1x32x16xbf16>
    %233 = vector.shape_cast %232 : vector<1x32x16xbf16> to vector<32x16xbf16>
    %234 = arith.truncf %221 : vector<16x32xf32> to vector<16x32xbf16>
    %cst_134 = arith.constant dense<0.000000e+00> : vector<16x16xf32>
    %235 = tpu.matmul %234, %233, %cst_134 {dimension_numbers = #tpu.dot_dimension_numbers<[1], [0], [0], [1], [0, 0, 1, 1], [], []>} : vector<16x32xbf16>, vector<32x16xbf16>, vector<16x16xf32> -> vector<16x16xf32>
    %c2_135 = arith.constant 2 : index
    %c0_136 = arith.constant 0 : index
    %c0_137 = arith.constant 0 : index
    %236 = vector.load %arg10[%c2_135, %c0_136, %c0_137] : memref<4x1x16xf32, #tpu.memory_space<vmem>>, vector<1x1x16xf32>
    %237 = vector.shape_cast %236 : vector<1x1x16xf32> to vector<1x16xf32>
    %238 = vector.broadcast %237 : vector<1x16xf32> to vector<16x16xf32>
    %239 = arith.addf %235, %238 : vector<16x16xf32>
    %c2_138 = arith.constant 2 : index
    %c0_139 = arith.constant 0 : index
    %c0_140 = arith.constant 0 : index
    %240 = vector.load %arg11[%c2_138, %c0_139, %c0_140] : memref<4x32x16xbf16, #tpu.memory_space<vmem>>, vector<1x32x16xbf16>
    %241 = vector.shape_cast %240 : vector<1x32x16xbf16> to vector<32x16xbf16>
    %242 = arith.truncf %221 : vector<16x32xf32> to vector<16x32xbf16>
    %cst_141 = arith.constant dense<0.000000e+00> : vector<16x16xf32>
    %243 = tpu.matmul %242, %241, %cst_141 {dimension_numbers = #tpu.dot_dimension_numbers<[1], [0], [0], [1], [0, 0, 1, 1], [], []>} : vector<16x32xbf16>, vector<32x16xbf16>, vector<16x16xf32> -> vector<16x16xf32>
    %c2_142 = arith.constant 2 : index
    %c0_143 = arith.constant 0 : index
    %c0_144 = arith.constant 0 : index
    %244 = vector.load %arg12[%c2_142, %c0_143, %c0_144] : memref<4x1x16xf32, #tpu.memory_space<vmem>>, vector<1x1x16xf32>
    %245 = vector.shape_cast %244 : vector<1x1x16xf32> to vector<1x16xf32>
    %246 = vector.broadcast %245 : vector<1x16xf32> to vector<16x16xf32>
    %247 = arith.addf %243, %246 : vector<16x16xf32>
    %248 = arith.truncf %231 : vector<16x16xf32> to vector<16x16xbf16>
    %249 = arith.truncf %239 : vector<16x16xf32> to vector<16x16xbf16>
    %cst_145 = arith.constant dense<0.000000e+00> : vector<16x16xf32>
    %250 = tpu.matmul %248, %249, %cst_145 {dimension_numbers = #tpu.dot_dimension_numbers<[1], [1], [0], [0], [0, 0, 1, 0], [], []>} : vector<16x16xbf16>, vector<16x16xbf16>, vector<16x16xf32> -> vector<16x16xf32>
    %251 = arith.addf %250, %43 : vector<16x16xf32>
    %cst_146 = arith.constant dense<0xFF800000> : vector<16xf32>
    %252 = vector.multi_reduction <maximumf>, %251, %cst_146 [1] : vector<16x16xf32> to vector<16xf32>
    %253 = vector.shape_cast %252 : vector<16xf32> to vector<16x1xf32>
    %254 = vector.broadcast %253 : vector<16x1xf32> to vector<16x16xf32>
    %255 = arith.subf %251, %254 : vector<16x16xf32>
    %256 = math.exp %255 : vector<16x16xf32>
    %cst_147 = arith.constant dense<0.000000e+00> : vector<16xf32>
    %257 = vector.multi_reduction <add>, %256, %cst_147 [1] : vector<16x16xf32> to vector<16xf32>
    %258 = vector.shape_cast %257 : vector<16xf32> to vector<16x1xf32>
    %259 = tpu.reciprocal %258 {approx = true} : vector<16x1xf32> -> vector<16x1xf32>
    %260 = vector.broadcast %259 : vector<16x1xf32> to vector<16x16xf32>
    %261 = arith.mulf %256, %260 : vector<16x16xf32>
    %262 = arith.truncf %261 : vector<16x16xf32> to vector<16x16xbf16>
    %263 = arith.truncf %247 : vector<16x16xf32> to vector<16x16xbf16>
    %cst_148 = arith.constant dense<0.000000e+00> : vector<16x16xf32>
    %264 = tpu.matmul %262, %263, %cst_148 {dimension_numbers = #tpu.dot_dimension_numbers<[1], [0], [0], [1], [0, 0, 1, 1], [], []>} : vector<16x16xbf16>, vector<16x16xbf16>, vector<16x16xf32> -> vector<16x16xf32>
    %c2_149 = arith.constant 2 : index
    %c0_150 = arith.constant 0 : index
    %c0_151 = arith.constant 0 : index
    %265 = vector.load %arg13[%c2_149, %c0_150, %c0_151] : memref<4x16x32xbf16, #tpu.memory_space<vmem>>, vector<1x16x32xbf16>
    %266 = vector.shape_cast %265 : vector<1x16x32xbf16> to vector<16x32xbf16>
    %267 = arith.truncf %264 : vector<16x16xf32> to vector<16x16xbf16>
    %cst_152 = arith.constant dense<0.000000e+00> : vector<16x32xf32>
    %268 = tpu.matmul %267, %266, %cst_152 {dimension_numbers = #tpu.dot_dimension_numbers<[1], [0], [0], [1], [0, 0, 1, 1], [], []>} : vector<16x16xbf16>, vector<16x32xbf16>, vector<16x32xf32> -> vector<16x32xf32>
    %269 = vector.broadcast %223 : vector<1x32xf32> to vector<16x32xf32>
    %270 = arith.addf %269, %268 : vector<16x32xf32>
    %c3 = arith.constant 3 : index
    %c0_153 = arith.constant 0 : index
    %c0_154 = arith.constant 0 : index
    %271 = vector.load %arg7[%c3, %c0_153, %c0_154] : memref<4x32x16xbf16, #tpu.memory_space<vmem>>, vector<1x32x16xbf16>
    %272 = vector.shape_cast %271 : vector<1x32x16xbf16> to vector<32x16xbf16>
    %273 = arith.truncf %221 : vector<16x32xf32> to vector<16x32xbf16>
    %cst_155 = arith.constant dense<0.000000e+00> : vector<16x16xf32>
    %274 = tpu.matmul %273, %272, %cst_155 {dimension_numbers = #tpu.dot_dimension_numbers<[1], [0], [0], [1], [0, 0, 1, 1], [], []>} : vector<16x32xbf16>, vector<32x16xbf16>, vector<16x16xf32> -> vector<16x16xf32>
    %c3_156 = arith.constant 3 : index
    %c0_157 = arith.constant 0 : index
    %c0_158 = arith.constant 0 : index
    %275 = vector.load %arg8[%c3_156, %c0_157, %c0_158] : memref<4x1x16xf32, #tpu.memory_space<vmem>>, vector<1x1x16xf32>
    %276 = vector.shape_cast %275 : vector<1x1x16xf32> to vector<1x16xf32>
    %277 = vector.broadcast %276 : vector<1x16xf32> to vector<16x16xf32>
    %278 = arith.addf %274, %277 : vector<16x16xf32>
    %c3_159 = arith.constant 3 : index
    %c0_160 = arith.constant 0 : index
    %c0_161 = arith.constant 0 : index
    %279 = vector.load %arg9[%c3_159, %c0_160, %c0_161] : memref<4x32x16xbf16, #tpu.memory_space<vmem>>, vector<1x32x16xbf16>
    %280 = vector.shape_cast %279 : vector<1x32x16xbf16> to vector<32x16xbf16>
    %281 = arith.truncf %221 : vector<16x32xf32> to vector<16x32xbf16>
    %cst_162 = arith.constant dense<0.000000e+00> : vector<16x16xf32>
    %282 = tpu.matmul %281, %280, %cst_162 {dimension_numbers = #tpu.dot_dimension_numbers<[1], [0], [0], [1], [0, 0, 1, 1], [], []>} : vector<16x32xbf16>, vector<32x16xbf16>, vector<16x16xf32> -> vector<16x16xf32>
    %c3_163 = arith.constant 3 : index
    %c0_164 = arith.constant 0 : index
    %c0_165 = arith.constant 0 : index
    %283 = vector.load %arg10[%c3_163, %c0_164, %c0_165] : memref<4x1x16xf32, #tpu.memory_space<vmem>>, vector<1x1x16xf32>
    %284 = vector.shape_cast %283 : vector<1x1x16xf32> to vector<1x16xf32>
    %285 = vector.broadcast %284 : vector<1x16xf32> to vector<16x16xf32>
    %286 = arith.addf %282, %285 : vector<16x16xf32>
    %c3_166 = arith.constant 3 : index
    %c0_167 = arith.constant 0 : index
    %c0_168 = arith.constant 0 : index
    %287 = vector.load %arg11[%c3_166, %c0_167, %c0_168] : memref<4x32x16xbf16, #tpu.memory_space<vmem>>, vector<1x32x16xbf16>
    %288 = vector.shape_cast %287 : vector<1x32x16xbf16> to vector<32x16xbf16>
    %289 = arith.truncf %221 : vector<16x32xf32> to vector<16x32xbf16>
    %cst_169 = arith.constant dense<0.000000e+00> : vector<16x16xf32>
    %290 = tpu.matmul %289, %288, %cst_169 {dimension_numbers = #tpu.dot_dimension_numbers<[1], [0], [0], [1], [0, 0, 1, 1], [], []>} : vector<16x32xbf16>, vector<32x16xbf16>, vector<16x16xf32> -> vector<16x16xf32>
    %c3_170 = arith.constant 3 : index
    %c0_171 = arith.constant 0 : index
    %c0_172 = arith.constant 0 : index
    %291 = vector.load %arg12[%c3_170, %c0_171, %c0_172] : memref<4x1x16xf32, #tpu.memory_space<vmem>>, vector<1x1x16xf32>
    %292 = vector.shape_cast %291 : vector<1x1x16xf32> to vector<1x16xf32>
    %293 = vector.broadcast %292 : vector<1x16xf32> to vector<16x16xf32>
    %294 = arith.addf %290, %293 : vector<16x16xf32>
    %295 = arith.truncf %278 : vector<16x16xf32> to vector<16x16xbf16>
    %296 = arith.truncf %286 : vector<16x16xf32> to vector<16x16xbf16>
    %cst_173 = arith.constant dense<0.000000e+00> : vector<16x16xf32>
    %297 = tpu.matmul %295, %296, %cst_173 {dimension_numbers = #tpu.dot_dimension_numbers<[1], [1], [0], [0], [0, 0, 1, 0], [], []>} : vector<16x16xbf16>, vector<16x16xbf16>, vector<16x16xf32> -> vector<16x16xf32>
    %298 = arith.addf %297, %43 : vector<16x16xf32>
    %cst_174 = arith.constant dense<0xFF800000> : vector<16xf32>
    %299 = vector.multi_reduction <maximumf>, %298, %cst_174 [1] : vector<16x16xf32> to vector<16xf32>
    %300 = vector.shape_cast %299 : vector<16xf32> to vector<16x1xf32>
    %301 = vector.broadcast %300 : vector<16x1xf32> to vector<16x16xf32>
    %302 = arith.subf %298, %301 : vector<16x16xf32>
    %303 = math.exp %302 : vector<16x16xf32>
    %cst_175 = arith.constant dense<0.000000e+00> : vector<16xf32>
    %304 = vector.multi_reduction <add>, %303, %cst_175 [1] : vector<16x16xf32> to vector<16xf32>
    %305 = vector.shape_cast %304 : vector<16xf32> to vector<16x1xf32>
    %306 = tpu.reciprocal %305 {approx = true} : vector<16x1xf32> -> vector<16x1xf32>
    %307 = vector.broadcast %306 : vector<16x1xf32> to vector<16x16xf32>
    %308 = arith.mulf %303, %307 : vector<16x16xf32>
    %309 = arith.truncf %308 : vector<16x16xf32> to vector<16x16xbf16>
    %310 = arith.truncf %294 : vector<16x16xf32> to vector<16x16xbf16>
    %cst_176 = arith.constant dense<0.000000e+00> : vector<16x16xf32>
    %311 = tpu.matmul %309, %310, %cst_176 {dimension_numbers = #tpu.dot_dimension_numbers<[1], [0], [0], [1], [0, 0, 1, 1], [], []>} : vector<16x16xbf16>, vector<16x16xbf16>, vector<16x16xf32> -> vector<16x16xf32>
    %c3_177 = arith.constant 3 : index
    %c0_178 = arith.constant 0 : index
    %c0_179 = arith.constant 0 : index
    %312 = vector.load %arg13[%c3_177, %c0_178, %c0_179] : memref<4x16x32xbf16, #tpu.memory_space<vmem>>, vector<1x16x32xbf16>
    %313 = vector.shape_cast %312 : vector<1x16x32xbf16> to vector<16x32xbf16>
    %314 = arith.truncf %311 : vector<16x16xf32> to vector<16x16xbf16>
    %cst_180 = arith.constant dense<0.000000e+00> : vector<16x32xf32>
    %315 = tpu.matmul %314, %313, %cst_180 {dimension_numbers = #tpu.dot_dimension_numbers<[1], [0], [0], [1], [0, 0, 1, 1], [], []>} : vector<16x16xbf16>, vector<16x32xbf16>, vector<16x32xf32> -> vector<16x32xf32>
    %316 = arith.addf %270, %315 : vector<16x32xf32>
    %317 = arith.addf %316, %221 : vector<16x32xf32>
    %c1_181 = arith.constant 1 : index
    %c0_182 = arith.constant 0 : index
    %c0_183 = arith.constant 0 : index
    %318 = vector.load %arg15[%c1_181, %c0_182, %c0_183] : memref<2x1x32xf32, #tpu.memory_space<vmem>>, vector<1x1x32xf32>
    %319 = vector.shape_cast %318 : vector<1x1x32xf32> to vector<1x32xf32>
    %c1_184 = arith.constant 1 : index
    %c0_185 = arith.constant 0 : index
    %c0_186 = arith.constant 0 : index
    %320 = vector.load %arg16[%c1_184, %c0_185, %c0_186] : memref<2x1x32xf32, #tpu.memory_space<vmem>>, vector<1x1x32xf32>
    %321 = vector.shape_cast %320 : vector<1x1x32xf32> to vector<1x32xf32>
    %cst_187 = arith.constant dense<0.000000e+00> : vector<16xf32>
    %322 = vector.multi_reduction <add>, %317, %cst_187 [1] : vector<16x32xf32> to vector<16xf32>
    %323 = vector.shape_cast %322 : vector<16xf32> to vector<16x1xf32>
    %cst_188 = arith.constant 3.200000e+01 : f32
    %324 = vector.broadcast %cst_188 : f32 to vector<16x1xf32>
    %325 = arith.divf %323, %324 : vector<16x1xf32>
    %326 = vector.broadcast %325 : vector<16x1xf32> to vector<16x32xf32>
    %327 = arith.subf %317, %326 : vector<16x32xf32>
    %328 = arith.mulf %327, %327 : vector<16x32xf32>
    %cst_189 = arith.constant dense<0.000000e+00> : vector<16xf32>
    %329 = vector.multi_reduction <add>, %328, %cst_189 [1] : vector<16x32xf32> to vector<16xf32>
    %330 = vector.shape_cast %329 : vector<16xf32> to vector<16x1xf32>
    %cst_190 = arith.constant 3.200000e+01 : f32
    %331 = vector.broadcast %cst_190 : f32 to vector<16x1xf32>
    %332 = arith.divf %330, %331 : vector<16x1xf32>
    %333 = vector.broadcast %325 : vector<16x1xf32> to vector<16x32xf32>
    %334 = arith.subf %317, %333 : vector<16x32xf32>
    %cst_191 = arith.constant 9.99999996E-13 : f32
    %335 = vector.broadcast %cst_191 : f32 to vector<16x1xf32>
    %336 = arith.addf %332, %335 : vector<16x1xf32>
    %337 = math.rsqrt %336 : vector<16x1xf32>
    %338 = vector.broadcast %337 : vector<16x1xf32> to vector<16x32xf32>
    %339 = arith.mulf %334, %338 : vector<16x32xf32>
    %340 = vector.broadcast %319 : vector<1x32xf32> to vector<16x32xf32>
    %341 = arith.mulf %339, %340 : vector<16x32xf32>
    %342 = vector.broadcast %321 : vector<1x32xf32> to vector<16x32xf32>
    %343 = arith.addf %341, %342 : vector<16x32xf32>
    %c1_192 = arith.constant 1 : index
    %c0_193 = arith.constant 0 : index
    %c0_194 = arith.constant 0 : index
    %344 = vector.load %arg17[%c1_192, %c0_193, %c0_194] : memref<2x32x64xbf16, #tpu.memory_space<vmem>>, vector<1x32x64xbf16>
    %345 = vector.shape_cast %344 : vector<1x32x64xbf16> to vector<32x64xbf16>
    %346 = arith.truncf %343 : vector<16x32xf32> to vector<16x32xbf16>
    %cst_195 = arith.constant dense<0.000000e+00> : vector<16x64xf32>
    %347 = tpu.matmul %346, %345, %cst_195 {dimension_numbers = #tpu.dot_dimension_numbers<[1], [0], [0], [1], [0, 0, 1, 1], [], []>} : vector<16x32xbf16>, vector<32x64xbf16>, vector<16x64xf32> -> vector<16x64xf32>
    %c1_196 = arith.constant 1 : index
    %c0_197 = arith.constant 0 : index
    %c0_198 = arith.constant 0 : index
    %348 = vector.load %arg18[%c1_196, %c0_197, %c0_198] : memref<2x1x64xf32, #tpu.memory_space<vmem>>, vector<1x1x64xf32>
    %349 = vector.shape_cast %348 : vector<1x1x64xf32> to vector<1x64xf32>
    %350 = vector.broadcast %349 : vector<1x64xf32> to vector<16x64xf32>
    %351 = arith.addf %347, %350 : vector<16x64xf32>
    %352 = arith.mulf %351, %351 : vector<16x64xf32>
    %353 = arith.mulf %351, %352 : vector<16x64xf32>
    %cst_199 = arith.constant 4.471500e-02 : f32
    %354 = vector.broadcast %cst_199 : f32 to vector<16x64xf32>
    %355 = arith.mulf %354, %353 : vector<16x64xf32>
    %356 = arith.addf %351, %355 : vector<16x64xf32>
    %cst_200 = arith.constant 0.797884583 : f32
    %357 = vector.broadcast %cst_200 : f32 to vector<16x64xf32>
    %358 = arith.mulf %357, %356 : vector<16x64xf32>
    %359 = math.tanh %358 : vector<16x64xf32>
    %cst_201 = arith.constant 1.000000e+00 : f32
    %360 = vector.broadcast %cst_201 : f32 to vector<16x64xf32>
    %361 = arith.addf %360, %359 : vector<16x64xf32>
    %cst_202 = arith.constant 5.000000e-01 : f32
    %362 = vector.broadcast %cst_202 : f32 to vector<16x64xf32>
    %363 = arith.mulf %362, %361 : vector<16x64xf32>
    %364 = arith.mulf %351, %363 : vector<16x64xf32>
    %c1_203 = arith.constant 1 : index
    %c0_204 = arith.constant 0 : index
    %c0_205 = arith.constant 0 : index
    %365 = vector.load %arg19[%c1_203, %c0_204, %c0_205] : memref<2x64x32xbf16, #tpu.memory_space<vmem>>, vector<1x64x32xbf16>
    %366 = vector.shape_cast %365 : vector<1x64x32xbf16> to vector<64x32xbf16>
    %367 = arith.truncf %364 : vector<16x64xf32> to vector<16x64xbf16>
    %cst_206 = arith.constant dense<0.000000e+00> : vector<16x32xf32>
    %368 = tpu.matmul %367, %366, %cst_206 {dimension_numbers = #tpu.dot_dimension_numbers<[1], [0], [0], [1], [0, 0, 1, 1], [], []>} : vector<16x64xbf16>, vector<64x32xbf16>, vector<16x32xf32> -> vector<16x32xf32>
    %c1_207 = arith.constant 1 : index
    %c0_208 = arith.constant 0 : index
    %c0_209 = arith.constant 0 : index
    %369 = vector.load %arg20[%c1_207, %c0_208, %c0_209] : memref<2x1x32xf32, #tpu.memory_space<vmem>>, vector<1x1x32xf32>
    %370 = vector.shape_cast %369 : vector<1x1x32xf32> to vector<1x32xf32>
    %371 = vector.broadcast %370 : vector<1x32xf32> to vector<16x32xf32>
    %372 = arith.addf %368, %371 : vector<16x32xf32>
    %373 = arith.addf %372, %343 : vector<16x32xf32>
    %c1_210 = arith.constant 1 : index
    %c0_211 = arith.constant 0 : index
    %c0_212 = arith.constant 0 : index
    %374 = vector.load %arg21[%c1_210, %c0_211, %c0_212] : memref<2x1x32xf32, #tpu.memory_space<vmem>>, vector<1x1x32xf32>
    %375 = vector.shape_cast %374 : vector<1x1x32xf32> to vector<1x32xf32>
    %c1_213 = arith.constant 1 : index
    %c0_214 = arith.constant 0 : index
    %c0_215 = arith.constant 0 : index
    %376 = vector.load %arg22[%c1_213, %c0_214, %c0_215] : memref<2x1x32xf32, #tpu.memory_space<vmem>>, vector<1x1x32xf32>
    %377 = vector.shape_cast %376 : vector<1x1x32xf32> to vector<1x32xf32>
    %cst_216 = arith.constant dense<0.000000e+00> : vector<16xf32>
    %378 = vector.multi_reduction <add>, %373, %cst_216 [1] : vector<16x32xf32> to vector<16xf32>
    %379 = vector.shape_cast %378 : vector<16xf32> to vector<16x1xf32>
    %cst_217 = arith.constant 3.200000e+01 : f32
    %380 = vector.broadcast %cst_217 : f32 to vector<16x1xf32>
    %381 = arith.divf %379, %380 : vector<16x1xf32>
    %382 = vector.broadcast %381 : vector<16x1xf32> to vector<16x32xf32>
    %383 = arith.subf %373, %382 : vector<16x32xf32>
    %384 = arith.mulf %383, %383 : vector<16x32xf32>
    %cst_218 = arith.constant dense<0.000000e+00> : vector<16xf32>
    %385 = vector.multi_reduction <add>, %384, %cst_218 [1] : vector<16x32xf32> to vector<16xf32>
    %386 = vector.shape_cast %385 : vector<16xf32> to vector<16x1xf32>
    %cst_219 = arith.constant 3.200000e+01 : f32
    %387 = vector.broadcast %cst_219 : f32 to vector<16x1xf32>
    %388 = arith.divf %386, %387 : vector<16x1xf32>
    %389 = vector.broadcast %381 : vector<16x1xf32> to vector<16x32xf32>
    %390 = arith.subf %373, %389 : vector<16x32xf32>
    %cst_220 = arith.constant 9.99999996E-13 : f32
    %391 = vector.broadcast %cst_220 : f32 to vector<16x1xf32>
    %392 = arith.addf %388, %391 : vector<16x1xf32>
    %393 = math.rsqrt %392 : vector<16x1xf32>
    %394 = vector.broadcast %393 : vector<16x1xf32> to vector<16x32xf32>
    %395 = arith.mulf %390, %394 : vector<16x32xf32>
    %396 = vector.broadcast %375 : vector<1x32xf32> to vector<16x32xf32>
    %397 = arith.mulf %395, %396 : vector<16x32xf32>
    %398 = vector.broadcast %377 : vector<1x32xf32> to vector<16x32xf32>
    %399 = arith.addf %397, %398 : vector<16x32xf32>
    %c0_221 = arith.constant 0 : index
    %c0_222 = arith.constant 0 : index
    %400 = vector.load %arg23[%c0_221, %c0_222] : memref<32x32xbf16, #tpu.memory_space<vmem>>, vector<32x32xbf16>
    %401 = arith.truncf %399 : vector<16x32xf32> to vector<16x32xbf16>
    %cst_223 = arith.constant dense<0.000000e+00> : vector<16x32xf32>
    %402 = tpu.matmul %401, %400, %cst_223 {dimension_numbers = #tpu.dot_dimension_numbers<[1], [0], [0], [1], [0, 0, 1, 1], [], []>} : vector<16x32xbf16>, vector<32x32xbf16>, vector<16x32xf32> -> vector<16x32xf32>
    %c0_224 = arith.constant 0 : index
    %c0_225 = arith.constant 0 : index
    %403 = vector.load %arg24[%c0_224, %c0_225] : memref<1x32xf32, #tpu.memory_space<vmem>>, vector<1x32xf32>
    %404 = vector.broadcast %403 : vector<1x32xf32> to vector<16x32xf32>
    %405 = arith.addf %402, %404 : vector<16x32xf32>
    %406 = math.tanh %405 : vector<16x32xf32>
    %c0_226 = arith.constant 0 : index
    %c0_227 = arith.constant 0 : index
    %407 = vector.load %arg25[%c0_226, %c0_227] : memref<32x512xbf16, #tpu.memory_space<vmem>>, vector<32x512xbf16>
    %408 = arith.truncf %406 : vector<16x32xf32> to vector<16x32xbf16>
    %cst_228 = arith.constant dense<0.000000e+00> : vector<16x512xf32>
    %409 = tpu.matmul %408, %407, %cst_228 {dimension_numbers = #tpu.dot_dimension_numbers<[1], [0], [0], [1], [0, 0, 1, 1], [], []>} : vector<16x32xbf16>, vector<32x512xbf16>, vector<16x512xf32> -> vector<16x512xf32>
    %c0_229 = arith.constant 0 : index
    %c0_230 = arith.constant 0 : index
    %410 = vector.load %arg26[%c0_229, %c0_230] : memref<1x512xf32, #tpu.memory_space<vmem>>, vector<1x512xf32>
    %411 = vector.broadcast %410 : vector<1x512xf32> to vector<16x512xf32>
    %412 = arith.addf %409, %411 : vector<16x512xf32>
    %cst_231 = arith.constant 0.000000e+00 : f32
    %413 = vector.broadcast %cst_231 : f32 to vector<16x512xf32>
    %414 = arith.maximumf %412, %413 : vector<16x512xf32>
    %c0_232 = arith.constant 0 : index
    %c0_233 = arith.constant 0 : index
    %415 = vector.load %arg27[%c0_232, %c0_233] : memref<512x128xbf16, #tpu.memory_space<vmem>>, vector<512x128xbf16>
    %416 = arith.truncf %414 : vector<16x512xf32> to vector<16x512xbf16>
    %cst_234 = arith.constant dense<0.000000e+00> : vector<16x128xf32>
    %417 = tpu.matmul %416, %415, %cst_234 {dimension_numbers = #tpu.dot_dimension_numbers<[1], [0], [0], [1], [0, 0, 1, 1], [], []>} : vector<16x512xbf16>, vector<512x128xbf16>, vector<16x128xf32> -> vector<16x128xf32>
    %c0_235 = arith.constant 0 : index
    %c0_236 = arith.constant 0 : index
    %418 = vector.load %arg28[%c0_235, %c0_236] : memref<1x128xf32, #tpu.memory_space<vmem>>, vector<1x128xf32>
    %419 = vector.broadcast %418 : vector<1x128xf32> to vector<16x128xf32>
    %420 = arith.addf %417, %419 : vector<16x128xf32>
    %421 = arith.negf %420 : vector<16x128xf32>
    %422 = math.exp %421 : vector<16x128xf32>
    %cst_237 = arith.constant 1.000000e+00 : f32
    %423 = vector.broadcast %cst_237 : f32 to vector<16x128xf32>
    %424 = arith.addf %423, %422 : vector<16x128xf32>
    %425 = arith.divf %423, %424 : vector<16x128xf32>
    %c0_238 = arith.constant 0 : index
    %c0_239 = arith.constant 0 : index
    %426 = vector.load %arg29[%c0_238, %c0_239] : memref<16x128xf32, #tpu.memory_space<vmem>>, vector<16x128xf32>
    tpu.vector_store %arg29[%c0_238, %c0_239], %425 {strides = array<i32>} : memref<16x128xf32, #tpu.memory_space<vmem>>, vector<16x128xf32>,
    return
  }
}

</mosaic_0001>

<bundles_post_ra>
// kernel: forward.1
= control target key start
LH: loop header
LB: loop body
LE: loop exit
PB: predicated region body
PF: predicated region fallthrough
CT: control target
= control target key end

     0   :  { %s3830_s6 = smov 1   ;;  %s3831_s10 = smov 2   ;;  %s4415_s0 = inlined_call_operand.smem [shape: u32[30], index: -1, kind: input, shape index: {}] }
   0x1   :  { %s3872_s5 = sld [smem:[%s4415_s0]]   ;;  %s3832_s14 = smov 3  }
   0x2   :  { %s3877_s9 = sld [smem:[%s4415_s0 + %s3830_s6]]   ;;  %s3833_s18 = smov 4  }
   0x3   :  { %s3882_s13 = sld [smem:[%s4415_s0 + %s3831_s10]]   ;;  %s3834_s22 = smov 5  }
   0x4   :  { %s3887_s17 = sld [smem:[%s4415_s0 + %s3832_s14]]   ;;  %s3835_s26 = smov 6  }
   0x5   :  { %s3892_s21 = sld [smem:[%s4415_s0 + %s3833_s18]]   ;;  %s3836_s30 = smov 7  }
   0x6   :  { %s3897_s25 = sld [smem:[%s4415_s0 + %s3834_s22]]   ;;  %s3837_s4 = smov 8  }
   0x7   :  { %s3902_s29 = sld [smem:[%s4415_s0 + %s3835_s26]]   ;;  %s3838_s10 = smov 9  }
   0x8   :  { %s3907_s3 = sld [smem:[%s4415_s0 + %s3836_s30]]   ;;  %s3839_s15 = smov 10  }
   0x9   :  { %s3912_s8 = sld [smem:[%s4415_s0 + %s3837_s4]]   ;;  %s3840_s20 = smov 11  }
   0xa   :  { %s3917_s14 = sld [smem:[%s4415_s0 + %s3838_s10]]   ;;  %s3841_s26 = smov 12  }
   0xb   :  { %s3922_s19 = sld [smem:[%s4415_s0 + %s3839_s15]]   ;;  %s3842_s1 = smov 13  }
   0xc   :  { %s3927_s24 = sld [smem:[%s4415_s0 + %s3840_s20]]   ;;  %s3843_s7 = smov 14  }
   0xd   :  { %s3932_s30 = sld [smem:[%s4415_s0 + %s3841_s26]]   ;;  %s3844_s15 = smov 15  }
   0xe   :  { %s3937_s6 = sld [smem:[%s4415_s0 + %s3842_s1]]   ;;  %s3845_s22 = smov 16  }
   0xf   :  { %s3942_s12 = sld [smem:[%s4415_s0 + %s3843_s7]]   ;;  %s3846_s28 = smov 17  }
  0x10   :  { %s3947_s20 = sld [smem:[%s4415_s0 + %s3844_s15]]   ;;  %s3847_s7 = smov 18  }
  0x11   :  { %s3952_s27 = sld [smem:[%s4415_s0 + %s3845_s22]]   ;;  %s3848_s15 = smov 19  }
  0x12   :  { %s3957_s4 = sld [smem:[%s4415_s0 + %s3846_s28]]   ;;  %s3849_s22 = smov 20  }
  0x13   :  { %s3850_s28 = smov 21  }
  0x15   :  { %4427 = sst [smem:[#allocation8_spill]] %s3942_s12 }
  0x16   :  { %4428 = sst [smem:[#allocation9_spill]] %s3947_s20 }
  0x17   :  { %4429 = sst [smem:[#allocation10_spill]] %s3952_s27 }
  0x18   :  { %4430 = sst [smem:[#allocation11_spill]] %s3957_s4 }
  0x19   :  { %s3962_s12 = sld [smem:[%s4415_s0 + %s3847_s7]]   ;;  %s3851_s7 = smov 22  }
  0x1a   :  { %s3967_s20 = sld [smem:[%s4415_s0 + %s3848_s15]]   ;;  %s3852_s15 = smov 23  }
  0x1b   :  { %s3972_s27 = sld [smem:[%s4415_s0 + %s3849_s22]]   ;;  %s3853_s22 = smov 24  }
  0x1c   :  { %s3977_s4 = sld [smem:[%s4415_s0 + %s3850_s28]]   ;;  %s3854_s28 = smov 25  }
  0x1f   :  { %4431 = sst [smem:[#allocation12_spill]] %s3962_s12 }
  0x20   :  { %4432 = sst [smem:[#allocation13_spill]] %s3967_s20 }
  0x21   :  { %4433 = sst [smem:[#allocation14_spill]] %s3972_s27 }
  0x22   :  { %4434 = sst [smem:[#allocation15_spill]] %s3977_s4 }
  0x23   :  { %s3982_s12 = sld [smem:[%s4415_s0 + %s3851_s7]]   ;;  %s3855_s7 = smov 26  }
  0x24   :  { %s3987_s20 = sld [smem:[%s4415_s0 + %s3852_s15]]   ;;  %s3856_s15 = smov 27  }
  0x25   :  { %s3992_s27 = sld [smem:[%s4415_s0 + %s3853_s22]]   ;;  %s3857_s22 = smov 28  }
  0x26   :  { %s3997_s4 = sld [smem:[%s4415_s0 + %s3854_s28]]   ;;  %s3858_s28 = smov 29  }
  0x29   :  { %4435 = sst [smem:[#allocation16_spill]] %s3982_s12 }
  0x2a   :  { %4436 = sst [smem:[#allocation17_spill]] %s3987_s20 }
  0x2b   :  { %4437 = sst [smem:[#allocation18_spill]] %s3992_s27 }
  0x2c   :  { %4438 = sst [smem:[#allocation19_spill]] %s3997_s4 }
  0x2d   :  { %s4002_s12 = sld [smem:[%s4415_s0 + %s3855_s7]]  }
  0x2e   :  { %s4007_s20 = sld [smem:[%s4415_s0 + %s3856_s15]]  }
  0x2f   :  { %s4012_s27 = sld [smem:[%s4415_s0 + %s3857_s22]]  }
  0x30   :  { %s4017_s4 = sld [smem:[%s4415_s0 + %s3858_s28]]  }
  0x31   :  { %64 = vsyncpa [#allocation3], 0 }
  0x32   :  { %65 = vsyncpa [#allocation5], 0  ;;  %s3859_s7 = smov [#allocation2]   ;;  %s3860_s11 = smov [#allocation4]  }
  0x33   :  { %s82_s10 = sshll.u32 %s3859_s7, 4  ;;  %s92_s15 = sshll.u32 %s3860_s11, 4  ;;  %s83_s10 = int_to_ptr.vmem [resolvable:$true] %s82_s10  ;;  %s93_s15 = int_to_ptr.vmem [resolvable:$true] %s92_s15 }
  0x34   :  { %s3782_s16 = scalar_lea.hbm %s3897_s25, 16 }
  0x35   :  { %p3783_p0 = scmp.ne.s32.totalorder %s3897_s25, %s3782_s16  ;;  %p3786_p1 = scmp.lt.u32.totalorder %s3782_s16, %s3897_s25 }
  0x37   :  { %p3788_p2 = pnand %p3786_p1, %p3783_p0 }
  0x39   :  { %3791 = shalt.err (!%p3788_p2)
}
  0x3a   :  { %s3792_s18 = scalar_lea.vmem %s83_s10, 16  ;;  %s3796_s0 = scalar_lea.vmem %s83_s10, 32 }
  0x3b   :  { %p3793_p3 = scmp.ne.s32.totalorder %s83_s10, %s3792_s18  ;;  %p3797_p4 = scmp.lt.s32.totalorder %s83_s10, %s83_s10 }
  0x3c   :  { %p3798_p5 = scmp.lt.s32.totalorder %s3796_s0, %s3792_s18 }
  0x3e   :  { %p3799_p6 = por %p3798_p5, %p3797_p4 }
  0x40   :  { %p3800_p7 = pnand %p3799_p6, %p3793_p3 }
  0x42   :  { %3803 = shalt.err (!%p3800_p7)
}
  0x43   :  { %85 = dma.hbm_to_vmem [thread:$0]  %s3897_s25, 16, %s83_s10, [#allocation3]  }
  0x44   :  { %s3804_s22 = scalar_lea.hbm %s3902_s29, 16 }
  0x45   :  { %p3805_p8 = scmp.ne.s32.totalorder %s3902_s29, %s3804_s22  ;;  %p3808_p9 = scmp.lt.u32.totalorder %s3804_s22, %s3902_s29 }
  0x47   :  { %p3810_p10 = pnand %p3808_p9, %p3805_p8 }
  0x49   :  { %3813 = shalt.err (!%p3810_p10)
}
  0x4a   :  { %s3814_s23 = scalar_lea.vmem %s93_s15, 16  ;;  %s3818_s26 = scalar_lea.vmem %s93_s15, 32 }
  0x4b   :  { %p3815_p11 = scmp.ne.s32.totalorder %s93_s15, %s3814_s23  ;;  %p3819_p12 = scmp.lt.s32.totalorder %s93_s15, %s93_s15 }
  0x4c   :  { %p3820_p13 = scmp.lt.s32.totalorder %s3818_s26, %s3814_s23 }
  0x4e   :  { %p3821_p0 = por %p3820_p13, %p3819_p12 }
  0x50   :  { %p3822_p1 = pnand %p3821_p0, %p3815_p11 }
  0x52   :  { %3825 = shalt.err (!%p3822_p1)
}
  0x53   :  { %95 = dma.hbm_to_vmem [thread:$0]  %s3902_s29, 16, %s93_s15, [#allocation5]  }
  0x54   :  { %3826 = dma.done.wait [#allocation3], 16  }
  0x55   :  { %3827 = vsyncadd [#allocation3], 4294967280 }
  0x56   :  { %3828 = dma.done.wait [#allocation5], 16  }
  0x57   :  { %3829 = vsyncadd [#allocation5], 4294967280  ;;  %v3861_v0 = vmov 0   ;;  %v3862_v1 = vmov 0.0   ;;  %v147_v2 = vld [vmem:[%s3872_s5] sm:$0xff]  ;;  %v148_v4 = vld [vmem:[%s3872_s5 + $0x8] sm:$0xff]  ;;  %v149_v12 = vlaneseq }
  0x58   :  { %3616 = vset.pattern.permute.xlu0 %v3861_v0  ;;  %3348 = vmatprep.subr.bf16.mxu0 %v3862_v1  ;;  %v3617_v3 = vld [vmem:[%s3887_s17] sm:$0xff]   ;;  %v3618_v5 = vld [vmem:[%s3887_s17 + $0x8] sm:$0xff]   ;;  %vm220_vm0 = vcmask 1041408   ;;  %v3619_v6 = vld [vmem:[%s3887_s17 + $0x10] sm:$0xff]   ;;  %vm3863_vm1 = vmmov 0   ;;  %vm216_vm4 = vcmask 818176  }
  0x59   :  { %3366 = vmatprep.subr.bf16.mxu1 %v3862_v1  ;;  %152 = vperm.xlu0 %3616, %v147_v2   ;;  %v3623_v7 = vld [vmem:[%s3887_s17 + $0x30] ss:$0 sps:$4 sm:$0x33]   ;;  %v3620_v8 = vld [vmem:[%s3887_s17 + $0x18] sm:$0xff]   ;;  %v3621_v10 = vld [vmem:[%s3887_s17 + $0x20] sm:$0xff]   ;;  %v150_v13 = vand.u32 127, %v149_v12 }
  0x5a   :  { %3349 = vmatpush3.bf16.msra.mxu0 %v3617_v3  ;;  %3362 = vmatprep.mubr.msk.bf16.mxu0 %vm3863_vm1, %v3862_v1  ;;  %v222_v9 = vsel %vm220_vm0, %v3623_v7, 0  ;;  %v3622_v11 = vld [vmem:[%s3887_s17 + $0x28] sm:$0xff]   ;;  %v175_v19 = vld [vmem:[%s3892_s21] sm:$0xff]  ;;  %vm267_vm5 = vcmask 261120   ;;  %vm523_vm6 = vcmask 130048   ;;  %s4439_s5 = sld [smem:[#allocation8_spill]] }
  0x5b   :  { %3350 = vmatprep.subr.bf16.mxu0 %v3862_v1  ;;  %3370 = vmatprep.mubr.msk.bf16.mxu1 %vm3863_vm1, %v3862_v1  ;;  %v176_v21 = vld [vmem:[%s3892_s21 + $0x8] sm:$0xff]  ;;  %v3624_v39 = vld [vmem:[%s3907_s3] sm:$0xff]   ;;  %s4442_s17 = sld [smem:[#allocation10_spill]]  ;;  %s4443_s21 = sld [smem:[#allocation13_spill]]  ;;  %vm1243_vm7 = vcmask 523264  }
  0x5c   :  { %3367 = vmatpush3.bf16.msra.mxu1 %v3624_v39  ;;  %v3625_v40 = vld [vmem:[%s3907_s3 + $0x8] sm:$0xff]   ;;  %v3002_v49 = vld [vmem:[#allocation2] ss:$0 sm:$0xff]  ;;  %v3003_v53 = vld [vmem:[#allocation4] ss:$0 sm:$0xff]  ;;  %s4444_s25 = sld [smem:[#allocation12_spill]] }
  0x5d   :  { %155 = vperm.xlu0 %3616, %v148_v4   ;;  %3368 = vmatprep.subr.bf16.mxu1 %v3862_v1  ;;  %v3626_v57 = vld [vmem:[%s3917_s14] sm:$0xff]   ;;  %v3627_v59 = vld [vmem:[%s3917_s14 + $0x8] sm:$0xff]   ;;  %s4445_s29 = sld [smem:[#allocation14_spill]]  ;;  %s4446_s28 = sld [smem:[#allocation15_spill]] }
  0x5e   :  { %3351 = vmatpush3.bf16.msra.mxu0 %v3618_v5  ;;  %v3628_v60 = vld [vmem:[%s3927_s24] sm:$0xff]   ;;  %v3629_v61 = vld [vmem:[%s3927_s24 + $0x8] sm:$0xff]   ;;  %s4447_s1 = sld [smem:[#allocation16_spill]] }
  0x5f   :  { %3352 = vmatprep.subr.bf16.mxu0 %v3862_v1  ;;  %v3004_v62 = vld [vmem:[%s3912_s8] ss:$0 sm:$0xff] }
  0x60   :  { %3369 = vmatpush3.bf16.msra.mxu1 %v3625_v40 }
  0x61   :  { %3374 = vmatprep.subr.bf16.mxu1 %v3862_v1 }
  0x62   :  { %3353 = vmatpush3.bf16.msra.mxu0 %v3619_v6 }
  0x63   :  { %3354 = vmatprep.subr.bf16.mxu0 %v3862_v1 }
  0x66   :  { %3355 = vmatpush3.bf16.msra.mxu0 %v3620_v8  ;;  %v3008_v8 = vld [vmem:[%s3922_s19] ss:$0 sm:$0xff] }
  0x67   :  { %3356 = vmatprep.subr.bf16.mxu0 %v3862_v1 }
  0x6a   :  { %3357 = vmatpush3.bf16.msra.mxu0 %v3621_v10 }
  0x6b   :  { %3358 = vmatprep.subr.bf16.mxu0 %v3862_v1 }
  0x6e   :  { %3359 = vmatpush3.bf16.msra.mxu0 %v3622_v11 }
  0x6f   :  { %3360 = vmatprep.subr.bf16.mxu0 %v3862_v1 }
  0x72   :  { %3361 = vmatpush3.bf16.msra.mxu0 %v222_v9 }
  0x73   :  { %3396 = vmatprep.subr.bf16.mxu0 %v3862_v1 }
  0xd8   :  { %v153_v14 = vpop.permute.xlu0 %152 }
  0xd9   :  { %vm157_vm2 = vcmp.eq.s32.totalorder %v153_v14, %v150_v13 }
  0xda   :  { %v159_v16 = vsel %vm157_vm2, 1.0, %v3862_v1 }
  0xdc   :  { %v156_v15 = vpop.permute.xlu0 %155 }
  0xdd   :  { %vm158_vm3 = vcmp.eq.s32.totalorder %v156_v15, %v150_v13 }
  0xde   :  { %v160_v17 = vsel %vm158_vm3, 1.0, %v3862_v1 }
  0xdf   :  { %v161_v18 = vpack.c.bf16 %v160_v17, %v159_v16 }
  0xe1   :  { %3363 = vmatmul.mubr.msk.bf16.vlgmr.msra.gmra.mrb[0].mxu0 %vm216_vm4, %v161_v18  ;;  %v3012_v18 = vld [vmem:[%s3932_s30] ss:$0 sm:$0xff] }
  0xe2   :  { %3398 = vmatprep.mubr.msk.bf16.mxu0 %vm3863_vm1, %v3862_v1 }
 0x1b4   :  { %v258_v20 = vpop.f32.mrb[0].mxu0 }
 0x1b5   :  { %v259_v22 = vadd.f32 %v258_v20, %v175_v19  ;;  %v3364_v23 = vpop.f32.mrb[1].mxu0 }
 0x1b6   :  { %v261_v24 = vpop.f32.mrb[2].mxu0 }
 0x1b7   :  { %v262_v25 = vadd.f32 %v261_v24, %v176_v21  ;;  %v3365_v26 = vpop.f32.mrb[3].mxu0  ;;  %v268_v27 = vsel %vm267_vm5, %v259_v22, 0.0 }
 0x1b8   :  { %269 = vadd.xlane.f32.xlu1 %v268_v27  ;;  %v311_v26 = vld [vmem:[%s3877_s9] sm:$0x1]  ;;  %v4104_v27 = vshrl.u32 %v149_v12, 7  ;;  %s4440_s9 = sld [smem:[#allocation11_spill]] }
 0x1b9   :  { %v271_v28 = vsel %vm267_vm5, %v262_v25, 0.0 }
 0x1bc   :  { %272 = vadd.xlane.f32.xlu1 %v271_v28  ;;  %v312_v28 = vsub.f32 1.0, %v311_v26 }
 0x245   :  { %v270_v29 = vpop.xlane.xlu1 %269 }
 0x246   :  { %v275_v30 = vmul.f32 0.03125, %v270_v29  ;;  %v313_v29 = vmul.f32 -10000.0, %v312_v28 }
 0x248   :  { %v277_v31 = vsub.f32 %v259_v22, %v275_v30  ;;  %v319_v30 = vsub.s32 0, %v4104_v27 }
 0x249   :  { %v273_v32 = vpop.xlane.xlu1 %272 }
 0x24a   :  { %v276_v33 = vmul.f32 0.03125, %v273_v32  ;;  %v279_v34 = vmul.f32 %v277_v31, %v277_v31  ;;  %v314_v32 = vld [vmem:[%s3882_s13] sm:$0xff] }
 0x24c   :  { %v278_v35 = vsub.f32 %v262_v25, %v276_v33  ;;  %v281_v36 = vsel %vm267_vm5, %v279_v34, 0.0  ;;  %v315_v33 = vld [vmem:[%s3882_s13 + $0x8] sm:$0xff]  ;;  %s4441_s13 = sld [smem:[#allocation9_spill]] }
 0x24d   :  { %282 = vadd.xlane.f32.xlu0 %v281_v36 }
 0x24e   :  { %v280_v37 = vmul.f32 %v278_v35, %v278_v35 }
 0x250   :  { %v284_v38 = vsel %vm267_vm5, %v280_v37, 0.0 }
 0x251   :  { %285 = vadd.xlane.f32.xlu1 %v284_v38 }
 0x2da   :  { %v283_v41 = vpop.xlane.xlu0 %282 }
 0x2db   :  { %v287_v42 = vmul.f32 0.03125, %v283_v41 }
 0x2dd   :  { %v289_v43 = vadd.f32 1e-12, %v287_v42 }
 0x2de   :  { %v286_v44 = vpop.xlane.xlu1 %285 }
 0x2df   :  { %3710 = vrsqrt.f32 %v289_v43  ;;  %v288_v45 = vmul.f32 0.03125, %v286_v44 }
 0x2e1   :  { %v290_v46 = vadd.f32 1e-12, %v288_v45 }
 0x2e3   :  { %3712 = vrsqrt.f32 %v290_v46 }
 0x2e9   :  { %v3711_v47 = vpop.eup %3710 }
 0x2ea   :  { %v293_v48 = vmul.f32 %v3711_v47, %v277_v31  ;;  %v320_v31 = vrot.slane %v313_v29, %v319_v30 }
 0x2ec   :  { %v301_v51 = vmul.f32 %v3002_v49, %v293_v48  ;;  %v4111_v34 = vadd.f32 %v320_v31, %v314_v32 }
 0x2ed   :  { %v3713_v50 = vpop.eup %3712 }
 0x2ee   :  { %v294_v52 = vmul.f32 %v3713_v50, %v278_v35  ;;  %v4065_v55 = vadd.f32 %v3003_v53, %v301_v51  ;;  %v4113_v35 = vadd.f32 %v320_v31, %v315_v33 }
 0x2f0   :  { %v302_v54 = vmul.f32 %v3002_v49, %v294_v52 }
 0x2f2   :  { %v4067_v56 = vadd.f32 %v3003_v53, %v302_v54  ;;  %v3634_v53 = vld [vmem:[%s3937_s6] sm:$0xff]  }
 0x2f4   :  { %v4072_v58 = vpack.c.bf16 %v4067_v56, %v4065_v55 }
 0x2f6   :  { %3371 = vmatmul.mubr.msk.bf16.vlgmr.msra.gmra.mrb[0].mxu1 %vm267_vm5, %v4072_v58 }
 0x2f7   :  { %3375 = vmatpush3.bf16.msra.mxu1 %v3626_v57  ;;  %3378 = vmatprep.mubr.msk.bf16.mxu1 %vm3863_vm1, %v3862_v1 }
 0x2f8   :  { %3376 = vmatprep.subr.bf16.mxu1 %v3862_v1 }
 0x2fb   :  { %3377 = vmatpush3.bf16.msra.mxu1 %v3627_v59 }
 0x2fc   :  { %3382 = vmatprep.subr.bf16.mxu1 %v3862_v1 }
 0x2fe   :  { %3379 = vmatmul.mubr.msk.bf16.vlgmr.msra.gmra.mrb[4].mxu1 %vm267_vm5, %v4072_v58 }
 0x2ff   :  { %3383 = vmatpush3.bf16.msra.mxu1 %v3628_v60  ;;  %3386 = vmatprep.mubr.msk.bf16.mxu1 %vm3863_vm1, %v3862_v1 }
 0x300   :  { %3384 = vmatprep.subr.bf16.mxu1 %v3862_v1 }
 0x303   :  { %3385 = vmatpush3.bf16.msra.mxu1 %v3629_v61 }
 0x304   :  { %3390 = vmatprep.subr.bf16.mxu1 %v3862_v1 }
 0x306   :  { %3387 = vmatmul.mubr.msk.bf16.vlgmr.msra.gmra.mrb[8].mxu1 %vm267_vm5, %v4072_v58 }
 0x307   :  { %3392 = vmatprep.mubr.msk.bf16.mxu1 %vm3863_vm1, %v3862_v1 }
 0x3c9   :  { %v386_v63 = vpop.f32.mrb[0].mxu1 }
 0x3ca   :  { %v3372_v2 = vpop.f32.mrb[1].mxu1  ;;  %v387_v4 = vadd.f32 %v3004_v62, %v386_v63  ;;  %v3630_v63 = vld [vmem:[%s3907_s3 + $0x10] sm:$0xff]  }
 0x3cb   :  { %v389_v3 = vpop.f32.mrb[2].mxu1 }
 0x3cc   :  { %v390_v5 = vadd.f32 %v3004_v62, %v389_v3  ;;  %v3373_v6 = vpop.f32.mrb[3].mxu1  ;;  %v3631_v3 = vld [vmem:[%s3907_s3 + $0x18] sm:$0xff]  }
 0x3ce   :  { %v521_v7 = vpack.c.bf16 %v390_v5, %v387_v4  ;;  %v3632_v4 = vld [vmem:[%s3927_s24 + $0x10] sm:$0xff]   ;;  %v3633_v5 = vld [vmem:[%s3927_s24 + $0x18] sm:$0xff]  }
 0x3d1   :  { %v450_v9 = vpop.f32.mrb[4].mxu1 }
 0x3d2   :  { %v3380_v10 = vpop.f32.mrb[5].mxu1  ;;  %v451_v13 = vadd.f32 %v3008_v8, %v450_v9  ;;  %v3635_v9 = vld [vmem:[%s3917_s14 + $0x10] sm:$0xff]  }
 0x3d3   :  { %v453_v11 = vpop.f32.mrb[6].mxu1 }
 0x3d4   :  { %v454_v14 = vadd.f32 %v3008_v8, %v453_v11  ;;  %v3381_v15 = vpop.f32.mrb[7].mxu1 }
 0x3d6   :  { %v522_v16 = vpack.c.bf16 %v454_v14, %v451_v13  ;;  %v3636_v13 = vld [vmem:[%s3917_s14 + $0x18] sm:$0xff]   ;;  %v3026_v14 = vld [vmem:[%s3912_s8 + $0x1] ss:$0 sm:$0xff] }
 0x3d8   :  { %v528_v17 = vsel %vm523_vm6, %v522_v16, 0 }
 0x3d9   :  { %v514_v19 = vpop.f32.mrb[8].mxu1  ;;  %3391 = vmatpush3.bf16.xpose.msra.mxu1 %v528_v17 }
 0x3da   :  { %v3388_v20 = vpop.f32.mrb[9].mxu1  ;;  %3402 = vmatprep.subr.bf16.mxu1 %v3862_v1  ;;  %v515_v22 = vadd.f32 %v3012_v18, %v514_v19 }
 0x3db   :  { %v517_v21 = vpop.f32.mrb[10].mxu1 }
 0x3dc   :  { %v518_v23 = vadd.f32 %v3012_v18, %v517_v21  ;;  %v3389_v24 = vpop.f32.mrb[11].mxu1 }
 0x3de   :  { %v594_v25 = vpack.c.bf16 %v518_v23, %v515_v22  ;;  %v3044_v22 = vld [vmem:[%s3932_s30 + $0x1] ss:$0 sm:$0xff] }
 0x3e0   :  { %3393 = vmatmul.mubr.msk.bf16.vlgmr.msra.gmra.mrb[12].mxu1 %vm523_vm6, %v521_v7  ;;  %3397 = vmatpush3.bf16.msra.mxu0 %v594_v25 }
 0x3e1   :  { %3408 = vmatprep.subr.bf16.mxu0 %v3862_v1  ;;  %3404 = vmatprep.mubr.msk.bf16.mxu1 %vm3863_vm1, %v3862_v1 }
 0x3e2   :  { %3403 = vmatpush3.bf16.msra.mxu1 %v3634_v53 }
 0x3e3   :  { %3416 = vmatprep.subr.bf16.mxu1 %v3862_v1 }
 0x4b3   :  { %v564_v36 = vpop.f32.mrb[12].mxu1 }
 0x4b4   :  { %v565_v37 = vadd.f32 %v564_v36, %v4111_v34  ;;  %v3394_v38 = vpop.f32.mrb[13].mxu1 }
 0x4b5   :  { %v567_v39 = vpop.f32.mrb[14].mxu1 }
 0x4b6   :  { %v568_v12 = vadd.f32 %v567_v39, %v4113_v35  ;;  %v3395_v40 = vpop.f32.mrb[15].mxu1  ;;  %v571_v41 = vsel %vm523_vm6, %v565_v37, -inf }
 0x4b7   :  { %572 = vmax.xlane.f32.xlu1 %v571_v41 }
 0x4b8   :  { %v574_v42 = vsel %vm523_vm6, %v568_v12, -inf }
 0x4bb   :  { %575 = vmax.xlane.f32.xlu1 %v574_v42 }
 0x544   :  { %v573_v43 = vpop.xlane.xlu1 %572 }
 0x545   :  { %v577_v44 = vsub.f32 %v565_v37, %v573_v43  ;;  %v3035_v37 = vld [vmem:[%s3922_s19 + $0x1] ss:$0 sm:$0xff] }
 0x547   :  { %v579_v45 = vmul.f32 1.442695, %v577_v44 }
 0x548   :  { %v576_v46 = vpop.xlane.xlu1 %575 }
 0x549   :  { %3714 = vpow2.f32 %v579_v45  ;;  %v578_v47 = vsub.f32 %v568_v12, %v576_v46 }
 0x54b   :  { %v581_v48 = vmul.f32 1.442695, %v578_v47 }
 0x54d   :  { %3716 = vpow2.f32 %v581_v48 }
 0x553   :  { %v3715_v49 = vpop.eup %3714 }
 0x554   :  { %v583_v50 = vsel %vm523_vm6, %v3715_v49, 0.0 }
 0x555   :  { %584 = vadd.xlane.f32.xlu1 %v583_v50 }
 0x557   :  { %v3717_v51 = vpop.eup %3716 }
 0x558   :  { %v586_v52 = vsel %vm523_vm6, %v3717_v51, 0.0 }
 0x559   :  { %587 = vadd.xlane.f32.xlu1 %v586_v52 }
 0x5e2   :  { %v585_v54 = vpop.xlane.xlu1 %584 }
 0x5e3   :  { %3718 = vrcp.f32 %v585_v54 }
 0x5e6   :  { %v588_v57 = vpop.xlane.xlu1 %587 }
 0x5e7   :  { %3720 = vrcp.f32 %v588_v57 }
 0x5ed   :  { %v3719_v59 = vpop.eup %3718 }
 0x5ee   :  { %v591_v61 = vmul.f32 %v3719_v59, %v3715_v49 }
 0x5f1   :  { %v3721_v60 = vpop.eup %3720 }
 0x5f2   :  { %v592_v62 = vmul.f32 %v3721_v60, %v3717_v51 }
 0x5f4   :  { %v593_v2 = vpack.c.bf16 %v592_v62, %v591_v61 }
 0x5f6   :  { %3399 = vmatmul.mubr.msk.bf16.vlgmr.msra.gmra.mrb[4].mxu0 %vm523_vm6, %v593_v2 }
 0x5f7   :  { %3409 = vmatpush3.bf16.msra.mxu0 %v3630_v63  ;;  %3412 = vmatprep.mubr.msk.bf16.mxu0 %vm3863_vm1, %v3862_v1 }
 0x5f8   :  { %3410 = vmatprep.subr.bf16.mxu0 %v3862_v1 }
 0x5fb   :  { %3411 = vmatpush3.bf16.msra.mxu0 %v3631_v3 }
 0x5fc   :  { %3424 = vmatprep.subr.bf16.mxu0 %v3862_v1 }
 0x5fe   :  { %3413 = vmatmul.mubr.msk.bf16.vlgmr.msra.gmra.mrb[8].mxu0 %vm267_vm5, %v4072_v58 }
 0x5ff   :  { %3425 = vmatpush3.bf16.msra.mxu0 %v3632_v4  ;;  %3428 = vmatprep.mubr.msk.bf16.mxu0 %vm3863_vm1, %v3862_v1  ;;  %v3637_v4 = vld [vmem:[%s3937_s6 + $0x8] sm:$0xff]  }
 0x600   :  { %3426 = vmatprep.subr.bf16.mxu0 %v3862_v1 }
 0x603   :  { %3427 = vmatpush3.bf16.msra.mxu0 %v3633_v5 }
 0x604   :  { %3438 = vmatprep.subr.bf16.mxu0 %v3862_v1 }
 0x606   :  { %3429 = vmatmul.mubr.msk.bf16.vlgmr.msra.gmra.mrb[12].mxu0 %vm267_vm5, %v4072_v58 }
 0x607   :  { %3440 = vmatprep.mubr.msk.bf16.mxu0 %vm3863_vm1, %v3862_v1 }
 0x6c9   :  { %v632_v6 = vpop.f32.mrb[4].mxu0 }
 0x6ca   :  { %v3400_v7 = vpop.f32.mrb[5].mxu0 }
 0x6cb   :  { %v635_v8 = vpop.f32.mrb[6].mxu0 }
 0x6cc   :  { %v641_v10 = vpack.c.bf16 %v635_v8, %v632_v6  ;;  %v3401_v11 = vpop.f32.mrb[7].mxu0 }
 0x6ce   :  { %3405 = vmatmul.mubr.msk.bf16.vlgmr.msra.gmra.mrb[16].mxu1 %vm523_vm6, %v641_v10 }
 0x6cf   :  { %3417 = vmatpush3.bf16.msra.mxu1 %v3635_v9  ;;  %3420 = vmatprep.mubr.msk.bf16.mxu1 %vm3863_vm1, %v3862_v1 }
 0x6d0   :  { %3418 = vmatprep.subr.bf16.mxu1 %v3862_v1 }
 0x6d1   :  { %v759_v15 = vpop.f32.mrb[8].mxu0 }
 0x6d2   :  { %v3414_v16 = vpop.f32.mrb[9].mxu0  ;;  %v760_v18 = vadd.f32 %v3026_v14, %v759_v15 }
 0x6d3   :  { %v762_v17 = vpop.f32.mrb[10].mxu0  ;;  %3419 = vmatpush3.bf16.msra.mxu1 %v3636_v13 }
 0x6d4   :  { %v763_v19 = vadd.f32 %v3026_v14, %v762_v17  ;;  %v3415_v20 = vpop.f32.mrb[11].mxu0  ;;  %3432 = vmatprep.subr.bf16.mxu1 %v3862_v1 }
 0x6d6   :  { %v898_v21 = vpack.c.bf16 %v763_v19, %v760_v18  ;;  %3421 = vmatmul.mubr.msk.bf16.vlgmr.msra.gmra.mrb[20].mxu1 %vm267_vm5, %v4072_v58  ;;  %v3020_v18 = vld [vmem:[%s4439_s5] ss:$0 sm:$0xff] }
 0x6d7   :  { %3434 = vmatprep.mubr.msk.bf16.mxu1 %vm3863_vm1, %v3862_v1 }
 0x6d9   :  { %v891_v23 = vpop.f32.mrb[12].mxu0 }
 0x6da   :  { %v3430_v24 = vpop.f32.mrb[13].mxu0  ;;  %v892_v26 = vadd.f32 %v3044_v22, %v891_v23 }
 0x6db   :  { %v894_v25 = vpop.f32.mrb[14].mxu0 }
 0x6dc   :  { %v895_v28 = vadd.f32 %v3044_v22, %v894_v25  ;;  %v3431_v29 = vpop.f32.mrb[15].mxu0 }
 0x6de   :  { %v970_v31 = vpack.c.bf16 %v895_v28, %v892_v26 }
 0x6e0   :  { %3439 = vmatpush3.bf16.msra.mxu0 %v970_v31 }
 0x6e1   :  { %3450 = vmatprep.subr.bf16.mxu0 %v3862_v1 }
 0x7a1   :  { %v4156_v32 = vpop.f32.mrb[16].mxu1 }
 0x7a2   :  { %v3406_v33 = vpop.f32.mrb[17].mxu1  ;;  %v698_v19 = vadd.f32 %v3020_v18, %v4156_v32 }
 0x7a3   :  { %v4158_v36 = vpop.f32.mrb[18].mxu1 }
 0x7a4   :  { %v3407_v58 = vpop.f32.mrb[19].mxu1 }
 0x7a9   :  { %v825_v38 = vpop.f32.mrb[20].mxu1 }
 0x7aa   :  { %v3422_v39 = vpop.f32.mrb[21].mxu1  ;;  %v826_v40 = vadd.f32 %v3035_v37, %v825_v38 }
 0x7ab   :  { %v828_v12 = vpop.f32.mrb[22].mxu1 }
 0x7ac   :  { %v829_v41 = vadd.f32 %v3035_v37, %v828_v12  ;;  %v3423_v42 = vpop.f32.mrb[23].mxu1 }
 0x7ad   :  { %v3639_v42 = vld [vmem:[%s4440_s9 + $0x8] sm:$0xff]  }
 0x7ae   :  { %v899_v43 = vpack.c.bf16 %v829_v41, %v826_v40 }
 0x7b0   :  { %v904_v44 = vsel %vm523_vm6, %v899_v43, 0 }
 0x7b1   :  { %3433 = vmatpush3.bf16.xpose.msra.mxu1 %v904_v44 }
 0x7b2   :  { %3444 = vmatprep.subr.bf16.mxu1 %v3862_v1 }
 0x7b8   :  { %3435 = vmatmul.mubr.msk.bf16.vlgmr.msra.gmra.mrb[24].mxu1 %vm523_vm6, %v898_v21  ;;  %v699_v21 = vadd.f32 %v3020_v18, %v4158_v36 }
 0x7b9   :  { %3446 = vmatprep.mubr.msk.bf16.mxu1 %vm3863_vm1, %v3862_v1  ;;  %3445 = vmatpush3.bf16.msra.mxu1 %v3637_v4  ;;  %v3643_v4 = vld [vmem:[%s4443_s21 + $0x18] sm:$0xff]  }
 0x7ba   :  { %3458 = vmatprep.subr.bf16.mxu1 %v3862_v1 }
 0x88b   :  { %v940_v45 = vpop.f32.mrb[24].mxu1 }
 0x88c   :  { %v941_v46 = vadd.f32 %v940_v45, %v4111_v34  ;;  %v3436_v47 = vpop.f32.mrb[25].mxu1 }
 0x88d   :  { %v943_v48 = vpop.f32.mrb[26].mxu1 }
 0x88e   :  { %v944_v49 = vadd.f32 %v943_v48, %v4113_v35  ;;  %v3437_v50 = vpop.f32.mrb[27].mxu1  ;;  %v947_v51 = vsel %vm523_vm6, %v941_v46, -inf }
 0x88f   :  { %948 = vmax.xlane.f32.xlu1 %v947_v51  ;;  %v3054_v50 = vld [vmem:[%s4441_s13] ss:$0 sm:$0xff] }
 0x890   :  { %v950_v52 = vsel %vm523_vm6, %v944_v49, -inf }
 0x893   :  { %951 = vmax.xlane.f32.xlu1 %v950_v52 }
 0x91c   :  { %v949_v53 = vpop.xlane.xlu1 %948 }
 0x91d   :  { %v953_v54 = vsub.f32 %v941_v46, %v949_v53 }
 0x91f   :  { %v955_v57 = vmul.f32 1.442695, %v953_v54 }
 0x920   :  { %v952_v59 = vpop.xlane.xlu1 %951 }
 0x921   :  { %3722 = vpow2.f32 %v955_v57  ;;  %v954_v60 = vsub.f32 %v944_v49, %v952_v59  ;;  %v3055_v57 = vld [vmem:[%s4442_s17] ss:$0 sm:$0xff] }
 0x923   :  { %v957_v61 = vmul.f32 1.442695, %v954_v60 }
 0x925   :  { %3724 = vpow2.f32 %v957_v61 }
 0x92b   :  { %v3723_v62 = vpop.eup %3722 }
 0x92c   :  { %v959_v63 = vsel %vm523_vm6, %v3723_v62, 0.0 }
 0x92d   :  { %960 = vadd.xlane.f32.xlu1 %v959_v63  ;;  %v3640_v63 = vld [vmem:[%s4443_s21] sm:$0xff]  }
 0x92f   :  { %v3725_v2 = vpop.eup %3724 }
 0x930   :  { %v962_v3 = vsel %vm523_vm6, %v3725_v2, 0.0 }
 0x931   :  { %963 = vadd.xlane.f32.xlu0 %v962_v3  ;;  %v3642_v3 = vld [vmem:[%s4443_s21 + $0x10] sm:$0xff]  }
 0x9ba   :  { %v961_v5 = vpop.xlane.xlu1 %960 }
 0x9bb   :  { %3726 = vrcp.f32 %v961_v5  ;;  %v3056_v5 = vld [vmem:[%s4444_s25] ss:$0 sm:$0xff] }
 0x9be   :  { %v964_v6 = vpop.xlane.xlu0 %963 }
 0x9bf   :  { %3728 = vrcp.f32 %v964_v6 }
 0x9c5   :  { %v3727_v7 = vpop.eup %3726 }
 0x9c6   :  { %v967_v9 = vmul.f32 %v3727_v7, %v3723_v62 }
 0x9c9   :  { %v3729_v8 = vpop.eup %3728 }
 0x9ca   :  { %v968_v10 = vmul.f32 %v3729_v8, %v3725_v2  ;;  %v3641_v2 = vld [vmem:[%s4443_s21 + $0x8] sm:$0xff]  }
 0x9cc   :  { %v969_v11 = vpack.c.bf16 %v968_v10, %v967_v9 }
 0x9ce   :  { %3441 = vmatmul.mubr.msk.bf16.vlgmr.msra.gmra.mrb[16].mxu0 %vm523_vm6, %v969_v11 }
 0x9cf   :  { %3454 = vmatprep.mubr.msk.bf16.mxu0 %vm3863_vm1, %v3862_v1 }
 0xaa1   :  { %v1008_v13 = vpop.f32.mrb[16].mxu0 }
 0xaa2   :  { %v3442_v14 = vpop.f32.mrb[17].mxu0 }
 0xaa3   :  { %v1011_v15 = vpop.f32.mrb[18].mxu0 }
 0xaa4   :  { %v1018_v16 = vpack.c.bf16 %v1011_v15, %v1008_v13  ;;  %v3443_v17 = vpop.f32.mrb[19].mxu0 }
 0xaa6   :  { %3447 = vmatmul.mubr.msk.bf16.vlgmr.msra.gmra.mrb[28].mxu1 %vm523_vm6, %v1018_v16 }
 0xaa7   :  { %3466 = vmatprep.mubr.msk.bf16.mxu1 %vm3863_vm1, %v3862_v1  ;;  %3459 = vmatpush3.bf16.msra.mxu1 %v3640_v63 }
 0xaa8   :  { %3460 = vmatprep.subr.bf16.mxu1 %v3862_v1 }
 0xaab   :  { %3461 = vmatpush3.bf16.msra.mxu1 %v3641_v2 }
 0xaac   :  { %3462 = vmatprep.subr.bf16.mxu1 %v3862_v1 }
 0xaaf   :  { %3463 = vmatpush3.bf16.msra.mxu1 %v3642_v3 }
 0xab0   :  { %3464 = vmatprep.subr.bf16.mxu1 %v3862_v1 }
 0xab3   :  { %3465 = vmatpush3.bf16.msra.mxu1 %v3643_v4 }
 0xab4   :  { %3486 = vmatprep.subr.bf16.mxu1 %v3862_v1 }
 0xb79   :  { %v1062_v20 = vpop.f32.mrb[28].mxu1 }
 0xb7a   :  { %v1069_v22 = vadd.f32 %v1062_v20, %v698_v19  ;;  %v3448_v23 = vpop.f32.mrb[29].mxu1 }
 0xb7b   :  { %v1065_v24 = vpop.f32.mrb[30].mxu1 }
 0xb7c   :  { %v1070_v25 = vadd.f32 %v1065_v24, %v699_v21  ;;  %v3449_v26 = vpop.f32.mrb[31].mxu1  ;;  %v1071_v28 = vadd.f32 %v1069_v22, %v4065_v55 }
 0xb7e   :  { %v1075_v29 = vsel %vm267_vm5, %v1071_v28, 0.0  ;;  %v1072_v31 = vadd.f32 %v1070_v25, %v4067_v56  ;;  %v3638_v56 = vld [vmem:[%s4440_s9] sm:$0xff]  }
 0xb7f   :  { %1076 = vadd.xlane.f32.xlu1 %v1075_v29  ;;  %3451 = vmatpush3.bf16.msra.mxu0 %v3638_v56 }
 0xb80   :  { %v1078_v33 = vsel %vm267_vm5, %v1072_v31, 0.0  ;;  %3452 = vmatprep.subr.bf16.mxu0 %v3862_v1 }
 0xb81   :  { %1079 = vadd.xlane.f32.xlu0 %v1078_v33 }
 0xb83   :  { %3453 = vmatpush3.bf16.msra.mxu0 %v3639_v42 }
 0xb84   :  { %3470 = vmatprep.subr.bf16.mxu0 %v3862_v1 }
 0xc0c   :  { %v1077_v32 = vpop.xlane.xlu1 %1076 }
 0xc0d   :  { %v1081_v58 = vmul.f32 0.03125, %v1077_v32 }
 0xc0e   :  { %v1080_v36 = vpop.xlane.xlu0 %1079 }
 0xc0f   :  { %v1083_v37 = vsub.f32 %v1071_v28, %v1081_v58  ;;  %v1082_v38 = vmul.f32 0.03125, %v1080_v36  ;;  %v3060_v58 = vld [vmem:[%s4445_s29] ss:$0 sm:$0xff] }
 0xc11   :  { %v1084_v39 = vsub.f32 %v1072_v31, %v1082_v38  ;;  %v1085_v12 = vmul.f32 %v1083_v37, %v1083_v37 }
 0xc13   :  { %v1087_v40 = vsel %vm267_vm5, %v1085_v12, 0.0  ;;  %v1086_v55 = vmul.f32 %v1084_v39, %v1084_v39 }
 0xc14   :  { %1088 = vadd.xlane.f32.xlu1 %v1087_v40 }
 0xc15   :  { %v1090_v41 = vsel %vm267_vm5, %v1086_v55, 0.0 }
 0xc16   :  { %1091 = vadd.xlane.f32.xlu0 %v1090_v41 }
 0xca1   :  { %v1089_v43 = vpop.xlane.xlu1 %1088 }
 0xca2   :  { %v1093_v44 = vmul.f32 0.03125, %v1089_v43 }
 0xca3   :  { %v1092_v45 = vpop.xlane.xlu0 %1091 }
 0xca4   :  { %v1095_v46 = vadd.f32 1e-12, %v1093_v44  ;;  %v1094_v47 = vmul.f32 0.03125, %v1092_v45 }
 0xca6   :  { %3730 = vrsqrt.f32 %v1095_v46  ;;  %v1096_v48 = vadd.f32 1e-12, %v1094_v47 }
 0xca8   :  { %3732 = vrsqrt.f32 %v1096_v48 }
 0xcb0   :  { %v3731_v49 = vpop.eup %3730 }
 0xcb1   :  { %v1099_v51 = vmul.f32 %v3731_v49, %v1083_v37 }
 0xcb2   :  { %v3733_v52 = vpop.eup %3732 }
 0xcb3   :  { %v1107_v53 = vmul.f32 %v3054_v50, %v1099_v51  ;;  %v1100_v54 = vmul.f32 %v3733_v52, %v1084_v39 }
 0xcb5   :  { %v1108_v59 = vmul.f32 %v3054_v50, %v1100_v54  ;;  %v1115_v60 = vadd.f32 %v3055_v57, %v1107_v53  ;;  %v3644_v53 = vld [vmem:[%s3907_s3 + $0x20] sm:$0xff]  }
 0xcb6   :  { %v3645_v54 = vld [vmem:[%s3927_s24 + $0x20] sm:$0xff]  }
 0xcb7   :  { %v1116_v61 = vadd.f32 %v3055_v57, %v1108_v59  ;;  %v3646_v57 = vld [vmem:[%s3907_s3 + $0x28] sm:$0xff]  }
 0xcb8   :  { %v3647_v59 = vld [vmem:[%s3927_s24 + $0x28] sm:$0xff]  }
 0xcb9   :  { %v1121_v62 = vpack.c.bf16 %v1116_v61, %v1115_v60 }
 0xcbb   :  { %3455 = vmatmul.mubr.msk.bf16.vlgmr.msra.gmra.mrb[20].mxu0 %vm267_vm5, %v1121_v62 }
 0xcbc   :  { %3474 = vmatprep.mubr.msk.bf16.mxu0 %vm3863_vm1, %v3862_v1  ;;  %3471 = vmatpush3.bf16.msra.mxu0 %v3644_v53 }
 0xcbd   :  { %3472 = vmatprep.subr.bf16.mxu0 %v3862_v1 }
 0xcc0   :  { %3473 = vmatpush3.bf16.msra.mxu0 %v3646_v57 }
 0xcc1   :  { %3478 = vmatprep.subr.bf16.mxu0 %v3862_v1 }
 0xd8e   :  { %v1178_v6 = vpop.f32.mrb[20].mxu0 }
 0xd8f   :  { %v1179_v7 = vadd.f32 %v3056_v5, %v1178_v6  ;;  %v3456_v8 = vpop.f32.mrb[21].mxu0 }
 0xd90   :  { %v1181_v9 = vpop.f32.mrb[22].mxu0 }
 0xd91   :  { %v1185_v10 = vmul.f32 %v1179_v7, %v1179_v7  ;;  %v1182_v11 = vadd.f32 %v3056_v5, %v1181_v9  ;;  %v3457_v13 = vpop.f32.mrb[23].mxu0  ;;  %v3066_v5 = vld [vmem:[%s4446_s28] ss:$0 sm:$0xff] }
 0xd93   :  { %v1187_v14 = vmul.f32 %v1185_v10, %v1179_v7  ;;  %v1186_v15 = vmul.f32 %v1182_v11, %v1182_v11  ;;  %v3067_v10 = vld [vmem:[%s4447_s1] ss:$0 sm:$0xff] }
 0xd95   :  { %v1189_v16 = vmul.f32 0.044715, %v1187_v14  ;;  %v1188_v17 = vmul.f32 %v1186_v15, %v1182_v11  ;;  %v3648_v15 = vld [vmem:[%s3917_s14 + $0x20] sm:$0xff]  }
 0xd97   :  { %v1191_v18 = vadd.f32 %v1189_v16, %v1179_v7  ;;  %v1190_v19 = vmul.f32 0.044715, %v1188_v17  ;;  %v3649_v17 = vld [vmem:[%s3917_s14 + $0x28] sm:$0xff]  }
 0xd99   :  { %v1193_v20 = vmul.f32 0.7978846, %v1191_v18  ;;  %v1192_v21 = vadd.f32 %v1190_v19, %v1182_v11  ;;  %v3074_v18 = vld [vmem:[%s3912_s8 + $0x2] ss:$0 sm:$0xff] }
 0xd9b   :  { %3734 = vtanh.f32 %v1193_v20  ;;  %v1194_v22 = vmul.f32 0.7978846, %v1192_v21  ;;  %v3092_v20 = vld [vmem:[%s3932_s30 + $0x2] ss:$0 sm:$0xff] }
 0xd9d   :  { %3736 = vtanh.f32 %v1194_v22 }
 0xda5   :  { %v3735_v23 = vpop.eup %3734 }
 0xda6   :  { %v1197_v24 = vadd.f32 1.0, %v3735_v23 }
 0xda7   :  { %v3737_v25 = vpop.eup %3736 }
 0xda8   :  { %v1199_v26 = vmul.f32 0.5, %v1197_v24  ;;  %v1198_v28 = vadd.f32 1.0, %v3737_v25 }
 0xdaa   :  { %v1200_v29 = vmul.f32 0.5, %v1198_v28  ;;  %v1201_v31 = vmul.f32 %v1199_v26, %v1179_v7 }
 0xdac   :  { %v1202_v33 = vmul.f32 %v1200_v29, %v1182_v11 }
 0xdae   :  { %v1211_v32 = vpack.c.bf16 %v1202_v33, %v1201_v31 }
 0xdb0   :  { %3467 = vmatmul.mubr.msk.bf16.vlgmr.msra.gmra.mrb[32].mxu1 %vm1243_vm7, %v1211_v32 }
 0xdb1   :  { %3490 = vmatprep.mubr.msk.bf16.mxu1 %vm3863_vm1, %v3862_v1  ;;  %3487 = vmatpush3.bf16.msra.mxu1 %v3645_v54 }
 0xdb2   :  { %3488 = vmatprep.subr.bf16.mxu1 %v3862_v1 }
 0xdb5   :  { %3489 = vmatpush3.bf16.msra.mxu1 %v3647_v59 }
 0xdb6   :  { %3500 = vmatprep.subr.bf16.mxu1 %v3862_v1 }
 0xe83   :  { %v1281_v36 = vpop.f32.mrb[32].mxu1 }
 0xe84   :  { %v1282_v37 = vadd.f32 %v3060_v58, %v1281_v36  ;;  %v3468_v38 = vpop.f32.mrb[33].mxu1 }
 0xe85   :  { %v1284_v39 = vpop.f32.mrb[34].mxu1 }
 0xe86   :  { %v1285_v12 = vadd.f32 %v3060_v58, %v1284_v39  ;;  %v3469_v40 = vpop.f32.mrb[35].mxu1  ;;  %v1288_v55 = vadd.f32 %v1282_v37, %v1115_v60  ;;  %v3083_v37 = vld [vmem:[%s3922_s19 + $0x2] ss:$0 sm:$0xff] }
 0xe88   :  { %v1292_v41 = vsel %vm267_vm5, %v1288_v55, 0.0  ;;  %v1289_v56 = vadd.f32 %v1285_v12, %v1116_v61 }
 0xe89   :  { %1293 = vadd.xlane.f32.xlu1 %v1292_v41 }
 0xe8a   :  { %v1295_v42 = vsel %vm267_vm5, %v1289_v56, 0.0 }
 0xe8b   :  { %1296 = vadd.xlane.f32.xlu0 %v1295_v42 }
 0xf16   :  { %v1294_v43 = vpop.xlane.xlu1 %1293 }
 0xf17   :  { %v1298_v44 = vmul.f32 0.03125, %v1294_v43 }
 0xf18   :  { %v1297_v45 = vpop.xlane.xlu0 %1296 }
 0xf19   :  { %v1300_v46 = vsub.f32 %v1288_v55, %v1298_v44  ;;  %v1299_v47 = vmul.f32 0.03125, %v1297_v45 }
 0xf1b   :  { %v1301_v48 = vsub.f32 %v1289_v56, %v1299_v47  ;;  %v1302_v49 = vmul.f32 %v1300_v46, %v1300_v46 }
 0xf1d   :  { %v1304_v50 = vsel %vm267_vm5, %v1302_v49, 0.0  ;;  %v1303_v51 = vmul.f32 %v1301_v48, %v1301_v48 }
 0xf1e   :  { %1305 = vadd.xlane.f32.xlu1 %v1304_v50 }
 0xf1f   :  { %v1307_v52 = vsel %vm267_vm5, %v1303_v51, 0.0 }
 0xf20   :  { %1308 = vadd.xlane.f32.xlu0 %v1307_v52 }
 0xfab   :  { %v1306_v60 = vpop.xlane.xlu1 %1305 }
 0xfac   :  { %v1310_v61 = vmul.f32 0.03125, %v1306_v60 }
 0xfad   :  { %v1309_v62 = vpop.xlane.xlu0 %1308 }
 0xfae   :  { %v1312_v63 = vadd.f32 1e-12, %v1310_v61  ;;  %v1311_v2 = vmul.f32 0.03125, %v1309_v62 }
 0xfb0   :  { %3738 = vrsqrt.f32 %v1312_v63  ;;  %v1313_v3 = vadd.f32 1e-12, %v1311_v2  ;;  %v3654_v2 = vld [vmem:[%s3937_s6 + $0x10] sm:$0xff]  }
 0xfb2   :  { %3740 = vrsqrt.f32 %v1313_v3 }
 0xfba   :  { %v3739_v4 = vpop.eup %3738 }
 0xfbb   :  { %v1316_v6 = vmul.f32 %v3739_v4, %v1300_v46 }
 0xfbc   :  { %v3741_v7 = vpop.eup %3740 }
 0xfbd   :  { %v1324_v8 = vmul.f32 %v3066_v5, %v1316_v6  ;;  %v1317_v9 = vmul.f32 %v3741_v7, %v1301_v48 }
 0xfbf   :  { %v1325_v11 = vmul.f32 %v3066_v5, %v1317_v9  ;;  %v4225_v13 = vadd.f32 %v3067_v10, %v1324_v8  ;;  %v3650_v9 = vld [vmem:[%s3907_s3 + $0x30] sm:$0xff]  }
 0xfc1   :  { %v4227_v14 = vadd.f32 %v3067_v10, %v1325_v11  ;;  %v3651_v11 = vld [vmem:[%s3907_s3 + $0x38] sm:$0xff]   ;;  %s4448_s3 = sld [smem:[#allocation17_spill]] }
 0xfc3   :  { %v4232_v16 = vpack.c.bf16 %v4227_v14, %v4225_v13 }
 0xfc5   :  { %3475 = vmatmul.mubr.msk.bf16.vlgmr.msra.gmra.mrb[24].mxu0 %vm267_vm5, %v4232_v16  ;;  %3491 = vmatmul.mubr.msk.bf16.vlgmr.msra.gmra.mrb[36].mxu1 %vm267_vm5, %v4232_v16 }
 0xfc6   :  { %3479 = vmatpush3.bf16.msra.mxu0 %v3648_v15  ;;  %3482 = vmatprep.mubr.msk.bf16.mxu0 %vm3863_vm1, %v3862_v1  ;;  %v3652_v15 = vld [vmem:[%s3927_s24 + $0x30] sm:$0xff]  }
 0xfc7   :  { %3480 = vmatprep.subr.bf16.mxu0 %v3862_v1  ;;  %3502 = vmatprep.mubr.msk.bf16.mxu1 %vm3863_vm1, %v3862_v1 }
 0xfca   :  { %3481 = vmatpush3.bf16.msra.mxu0 %v3649_v17  ;;  %v3653_v17 = vld [vmem:[%s3927_s24 + $0x38] sm:$0xff]  }
 0xfcb   :  { %3494 = vmatprep.subr.bf16.mxu0 %v3862_v1 }
 0xfcd   :  { %3483 = vmatmul.mubr.msk.bf16.vlgmr.msra.gmra.mrb[28].mxu0 %vm267_vm5, %v4232_v16 }
 0xfce   :  { %3496 = vmatprep.mubr.msk.bf16.mxu0 %vm3863_vm1, %v3862_v1 }
0x1098   :  { %v1399_v19 = vpop.f32.mrb[24].mxu0  ;;  %v1531_v21 = vpop.f32.mrb[36].mxu1 }
0x1099   :  { %v3476_v22 = vpop.f32.mrb[25].mxu0  ;;  %v3492_v23 = vpop.f32.mrb[37].mxu1  ;;  %v1400_v26 = vadd.f32 %v3074_v18, %v1399_v19  ;;  %v1532_v28 = vadd.f32 %v3092_v20, %v1531_v21  ;;  %v3655_v21 = vld [vmem:[%s3917_s14 + $0x30] sm:$0xff]  }
0x109a   :  { %v1402_v24 = vpop.f32.mrb[26].mxu0  ;;  %v1534_v25 = vpop.f32.mrb[38].mxu1 }
0x109b   :  { %v1403_v29 = vadd.f32 %v3074_v18, %v1402_v24  ;;  %v1535_v31 = vadd.f32 %v3092_v20, %v1534_v25  ;;  %v3477_v33 = vpop.f32.mrb[27].mxu0  ;;  %v3493_v32 = vpop.f32.mrb[39].mxu1  ;;  %v3656_v24 = vld [vmem:[%s3917_s14 + $0x38] sm:$0xff]   ;;  %v3108_v25 = vld [vmem:[%s3912_s8 + $0x3] ss:$0 sm:$0xff]  ;;  %s4449_s8 = sld [smem:[#allocation19_spill]] }
0x109c   :  { %s4450_s14 = sld [smem:[#allocation18_spill]] }
0x109d   :  { %v1538_v58 = vpack.c.bf16 %v1403_v29, %v1400_v26  ;;  %v1610_v36 = vpack.c.bf16 %v1535_v31, %v1532_v28 }
0x109f   :  { %3501 = vmatpush3.bf16.msra.mxu1 %v1610_v36  ;;  %v3126_v36 = vld [vmem:[%s3932_s30 + $0x3] ss:$0 sm:$0xff] }
0x10a0   :  { %v1465_v38 = vpop.f32.mrb[28].mxu0  ;;  %3512 = vmatprep.subr.bf16.mxu1 %v3862_v1 }
0x10a1   :  { %v3484_v39 = vpop.f32.mrb[29].mxu0  ;;  %v1466_v40 = vadd.f32 %v3083_v37, %v1465_v38 }
0x10a2   :  { %v1468_v12 = vpop.f32.mrb[30].mxu0 }
0x10a3   :  { %v1469_v55 = vadd.f32 %v3083_v37, %v1468_v12  ;;  %v3485_v41 = vpop.f32.mrb[31].mxu0 }
0x10a5   :  { %v1539_v56 = vpack.c.bf16 %v1469_v55, %v1466_v40 }
0x10a7   :  { %v1544_v42 = vsel %vm523_vm6, %v1539_v56, 0 }
0x10a8   :  { %3495 = vmatpush3.bf16.xpose.msra.mxu0 %v1544_v42 }
0x10a9   :  { %3506 = vmatprep.subr.bf16.mxu0 %v3862_v1 }
0x10af   :  { %3497 = vmatmul.mubr.msk.bf16.vlgmr.msra.gmra.mrb[32].mxu0 %vm523_vm6, %v1538_v58 }
0x10b0   :  { %3508 = vmatprep.mubr.msk.bf16.mxu0 %vm3863_vm1, %v3862_v1  ;;  %3507 = vmatpush3.bf16.msra.mxu0 %v3654_v2 }
0x10b1   :  { %3520 = vmatprep.subr.bf16.mxu0 %v3862_v1 }
0x1182   :  { %v1580_v43 = vpop.f32.mrb[32].mxu0 }
0x1183   :  { %v1581_v44 = vadd.f32 %v1580_v43, %v4111_v34  ;;  %v3498_v45 = vpop.f32.mrb[33].mxu0 }
0x1184   :  { %v1583_v46 = vpop.f32.mrb[34].mxu0 }
0x1185   :  { %v1584_v47 = vadd.f32 %v1583_v46, %v4113_v35  ;;  %v3499_v48 = vpop.f32.mrb[35].mxu0  ;;  %v1587_v49 = vsel %vm523_vm6, %v1581_v44, -inf }
0x1186   :  { %1588 = vmax.xlane.f32.xlu1 %v1587_v49 }
0x1187   :  { %v1590_v50 = vsel %vm523_vm6, %v1584_v47, -inf }
0x1188   :  { %1591 = vmax.xlane.f32.xlu0 %v1590_v50 }
0x1213   :  { %v1589_v51 = vpop.xlane.xlu1 %1588 }
0x1214   :  { %v1593_v52 = vsub.f32 %v1581_v44, %v1589_v51  ;;  %v3117_v44 = vld [vmem:[%s3922_s19 + $0x3] ss:$0 sm:$0xff] }
0x1215   :  { %v1592_v53 = vpop.xlane.xlu0 %1591 }
0x1216   :  { %v1595_v54 = vmul.f32 1.442695, %v1593_v52  ;;  %v1594_v57 = vsub.f32 %v1584_v47, %v1592_v53 }
0x1218   :  { %3742 = vpow2.f32 %v1595_v54  ;;  %v1597_v59 = vmul.f32 1.442695, %v1594_v57 }
0x121a   :  { %3744 = vpow2.f32 %v1597_v59 }
0x1222   :  { %v3743_v60 = vpop.eup %3742 }
0x1223   :  { %v1599_v61 = vsel %vm523_vm6, %v3743_v60, 0.0 }
0x1224   :  { %v3745_v62 = vpop.eup %3744  ;;  %1600 = vadd.xlane.f32.xlu1 %v1599_v61 }
0x1225   :  { %v1602_v63 = vsel %vm523_vm6, %v3745_v62, 0.0 }
0x1226   :  { %1603 = vadd.xlane.f32.xlu0 %v1602_v63 }
0x12b1   :  { %v1601_v3 = vpop.xlane.xlu1 %1600 }
0x12b2   :  { %3746 = vrcp.f32 %v1601_v3 }
0x12b3   :  { %v1604_v4 = vpop.xlane.xlu0 %1603 }
0x12b4   :  { %3748 = vrcp.f32 %v1604_v4 }
0x12bc   :  { %v3747_v5 = vpop.eup %3746 }
0x12bd   :  { %v1607_v7 = vmul.f32 %v3747_v5, %v3743_v60 }
0x12be   :  { %v3749_v6 = vpop.eup %3748 }
0x12bf   :  { %v1608_v8 = vmul.f32 %v3749_v6, %v3745_v62 }
0x12c1   :  { %v1609_v10 = vpack.c.bf16 %v1608_v8, %v1607_v7 }
0x12c3   :  { %3503 = vmatmul.mubr.msk.bf16.vlgmr.msra.gmra.mrb[40].mxu1 %vm523_vm6, %v1609_v10  ;;  %v3657_v10 = vld [vmem:[%s3937_s6 + $0x18] sm:$0xff]  }
0x12c4   :  { %3513 = vmatpush3.bf16.msra.mxu1 %v3650_v9  ;;  %3516 = vmatprep.mubr.msk.bf16.mxu1 %vm3863_vm1, %v3862_v1 }
0x12c5   :  { %3514 = vmatprep.subr.bf16.mxu1 %v3862_v1 }
0x12c8   :  { %3515 = vmatpush3.bf16.msra.mxu1 %v3651_v11 }
0x12c9   :  { %3528 = vmatprep.subr.bf16.mxu1 %v3862_v1 }
0x12cb   :  { %3517 = vmatmul.mubr.msk.bf16.vlgmr.msra.gmra.mrb[44].mxu1 %vm267_vm5, %v4232_v16 }
0x12cc   :  { %3529 = vmatpush3.bf16.msra.mxu1 %v3652_v15  ;;  %3532 = vmatprep.mubr.msk.bf16.mxu1 %vm3863_vm1, %v3862_v1 }
0x12cd   :  { %3530 = vmatprep.subr.bf16.mxu1 %v3862_v1 }
0x12d0   :  { %3531 = vmatpush3.bf16.msra.mxu1 %v3653_v17 }
0x12d1   :  { %3542 = vmatprep.subr.bf16.mxu1 %v3862_v1 }
0x12d3   :  { %3533 = vmatmul.mubr.msk.bf16.vlgmr.msra.gmra.mrb[48].mxu1 %vm267_vm5, %v4232_v16 }
0x12d4   :  { %3544 = vmatprep.mubr.msk.bf16.mxu1 %vm3863_vm1, %v3862_v1 }
0x1396   :  { %v1648_v18 = vpop.f32.mrb[40].mxu1 }
0x1397   :  { %v3504_v19 = vpop.f32.mrb[41].mxu1 }
0x1398   :  { %v1651_v20 = vpop.f32.mrb[42].mxu1 }
0x1399   :  { %v1658_v22 = vpack.c.bf16 %v1651_v20, %v1648_v18  ;;  %v3505_v23 = vpop.f32.mrb[43].mxu1 }
0x139b   :  { %3509 = vmatmul.mubr.msk.bf16.vlgmr.msra.gmra.mrb[36].mxu0 %vm523_vm6, %v1658_v22 }
0x139c   :  { %3521 = vmatpush3.bf16.msra.mxu0 %v3655_v21  ;;  %3524 = vmatprep.mubr.msk.bf16.mxu0 %vm3863_vm1, %v3862_v1 }
0x139d   :  { %3522 = vmatprep.subr.bf16.mxu0 %v3862_v1 }
0x139e   :  { %v1776_v26 = vpop.f32.mrb[44].mxu1 }
0x139f   :  { %v3518_v28 = vpop.f32.mrb[45].mxu1  ;;  %v1777_v31 = vadd.f32 %v3108_v25, %v1776_v26 }
0x13a0   :  { %v1779_v29 = vpop.f32.mrb[46].mxu1  ;;  %3523 = vmatpush3.bf16.msra.mxu0 %v3656_v24  ;;  %v3102_v28 = vld [vmem:[%s4439_s5 + $0x1] ss:$0 sm:$0xff] }
0x13a1   :  { %v1780_v33 = vadd.f32 %v3108_v25, %v1779_v29  ;;  %v3519_v32 = vpop.f32.mrb[47].mxu1  ;;  %3536 = vmatprep.subr.bf16.mxu0 %v3862_v1 }
0x13a3   :  { %v1915_v58 = vpack.c.bf16 %v1780_v33, %v1777_v31  ;;  %3525 = vmatmul.mubr.msk.bf16.vlgmr.msra.gmra.mrb[40].mxu0 %vm267_vm5, %v4232_v16 }
0x13a4   :  { %3538 = vmatprep.mubr.msk.bf16.mxu0 %vm3863_vm1, %v3862_v1 }
0x13a6   :  { %v1908_v37 = vpop.f32.mrb[48].mxu1 }
0x13a7   :  { %v3534_v38 = vpop.f32.mrb[49].mxu1  ;;  %v1909_v12 = vadd.f32 %v3126_v36, %v1908_v37 }
0x13a8   :  { %v1911_v39 = vpop.f32.mrb[50].mxu1 }
0x13a9   :  { %v1912_v40 = vadd.f32 %v3126_v36, %v1911_v39  ;;  %v3535_v55 = vpop.f32.mrb[51].mxu1 }
0x13ab   :  { %v1987_v41 = vpack.c.bf16 %v1912_v40, %v1909_v12 }
0x13ad   :  { %3543 = vmatpush3.bf16.msra.mxu1 %v1987_v41 }
0x13ae   :  { %3554 = vmatprep.subr.bf16.mxu1 %v3862_v1 }
0x146e   :  { %v4299_v56 = vpop.f32.mrb[36].mxu0 }
0x146f   :  { %v3510_v42 = vpop.f32.mrb[37].mxu0  ;;  %v1715_v29 = vadd.f32 %v3102_v28, %v4299_v56 }
0x1470   :  { %v4301_v43 = vpop.f32.mrb[38].mxu0 }
0x1471   :  { %v3511_v16 = vpop.f32.mrb[39].mxu0  ;;  %v1716_v33 = vadd.f32 %v3102_v28, %v4301_v43 }
0x1476   :  { %v1842_v45 = vpop.f32.mrb[40].mxu0 }
0x1477   :  { %v3526_v46 = vpop.f32.mrb[41].mxu0  ;;  %v1843_v48 = vadd.f32 %v3117_v44, %v1842_v45 }
0x1478   :  { %v1845_v47 = vpop.f32.mrb[42].mxu0 }
0x1479   :  { %v1846_v49 = vadd.f32 %v3117_v44, %v1845_v47  ;;  %v3527_v50 = vpop.f32.mrb[43].mxu0 }
0x147b   :  { %v1916_v51 = vpack.c.bf16 %v1846_v49, %v1843_v48  ;;  %v3659_v48 = vld [vmem:[%s4440_s9 + $0x18] sm:$0xff]  }
0x147d   :  { %v1921_v52 = vsel %vm523_vm6, %v1916_v51, 0 }
0x147e   :  { %3537 = vmatpush3.bf16.xpose.msra.mxu0 %v1921_v52 }
0x147f   :  { %3548 = vmatprep.subr.bf16.mxu0 %v3862_v1 }
0x1485   :  { %3539 = vmatmul.mubr.msk.bf16.vlgmr.msra.gmra.mrb[44].mxu0 %vm523_vm6, %v1915_v58 }
0x1486   :  { %3550 = vmatprep.mubr.msk.bf16.mxu0 %vm3863_vm1, %v3862_v1  ;;  %3549 = vmatpush3.bf16.msra.mxu0 %v3657_v10 }
0x1487   :  { %3562 = vmatprep.subr.bf16.mxu0 %v3862_v1 }
0x1558   :  { %v1957_v53 = vpop.f32.mrb[44].mxu0 }
0x1559   :  { %v1958_v54 = vadd.f32 %v1957_v53, %v4111_v34  ;;  %v3540_v57 = vpop.f32.mrb[45].mxu0 }
0x155a   :  { %v1960_v59 = vpop.f32.mrb[46].mxu0 }
0x155b   :  { %v1961_v60 = vadd.f32 %v1960_v59, %v4113_v35  ;;  %v3541_v61 = vpop.f32.mrb[47].mxu0  ;;  %v1964_v62 = vsel %vm523_vm6, %v1958_v54, -inf  ;;  %v3138_v59 = vld [vmem:[%s4441_s13 + $0x1] ss:$0 sm:$0xff] }
0x155c   :  { %1965 = vmax.xlane.f32.xlu1 %v1964_v62 }
0x155d   :  { %v1967_v63 = vsel %vm523_vm6, %v1961_v60, -inf }
0x155e   :  { %1968 = vmax.xlane.f32.xlu0 %v1967_v63 }
0x15e9   :  { %v1966_v2 = vpop.xlane.xlu1 %1965 }
0x15ea   :  { %v1970_v3 = vsub.f32 %v1958_v54, %v1966_v2  ;;  %v3139_v2 = vld [vmem:[%s4442_s17 + $0x1] ss:$0 sm:$0xff] }
0x15eb   :  { %v1969_v4 = vpop.xlane.xlu0 %1968 }
0x15ec   :  { %v1972_v5 = vmul.f32 1.442695, %v1970_v3  ;;  %v1971_v6 = vsub.f32 %v1961_v60, %v1969_v4 }
0x15ee   :  { %3750 = vpow2.f32 %v1972_v5  ;;  %v1974_v7 = vmul.f32 1.442695, %v1971_v6 }
0x15f0   :  { %3752 = vpow2.f32 %v1974_v7  ;;  %v3660_v7 = vld [vmem:[%s4443_s21 + $0x20] sm:$0xff]  }
0x15f8   :  { %v3751_v34 = vpop.eup %3750 }
0x15f9   :  { %v1976_v8 = vsel %vm523_vm6, %v3751_v34, 0.0 }
0x15fa   :  { %v3753_v35 = vpop.eup %3752  ;;  %1977 = vadd.xlane.f32.xlu1 %v1976_v8  ;;  %v3662_v8 = vld [vmem:[%s4443_s21 + $0x30] sm:$0xff]  }
0x15fb   :  { %v1979_v9 = vsel %vm523_vm6, %v3753_v35, 0.0 }
0x15fc   :  { %1980 = vadd.xlane.f32.xlu0 %v1979_v9  ;;  %v3145_v9 = vld [vmem:[%s4444_s25 + $0x1] ss:$0 sm:$0xff] }
0x1687   :  { %v1978_v11 = vpop.xlane.xlu1 %1977 }
0x1688   :  { %3754 = vrcp.f32 %v1978_v11 }
0x1689   :  { %v1981_v15 = vpop.xlane.xlu0 %1980 }
0x168a   :  { %3756 = vrcp.f32 %v1981_v15 }
0x1692   :  { %v3755_v17 = vpop.eup %3754 }
0x1693   :  { %v1984_v19 = vmul.f32 %v3755_v17, %v3751_v34  ;;  %v3661_v34 = vld [vmem:[%s4443_s21 + $0x28] sm:$0xff]  }
0x1694   :  { %v3757_v18 = vpop.eup %3756 }
0x1695   :  { %v1985_v20 = vmul.f32 %v3757_v18, %v3753_v35  ;;  %v3663_v35 = vld [vmem:[%s4443_s21 + $0x38] sm:$0xff]  }
0x1697   :  { %v1986_v21 = vpack.c.bf16 %v1985_v20, %v1984_v19 }
0x1699   :  { %3545 = vmatmul.mubr.msk.bf16.vlgmr.msra.gmra.mrb[52].mxu1 %vm523_vm6, %v1986_v21 }
0x169a   :  { %3558 = vmatprep.mubr.msk.bf16.mxu1 %vm3863_vm1, %v3862_v1 }
0x176c   :  { %v2025_v22 = vpop.f32.mrb[52].mxu1 }
0x176d   :  { %v3546_v23 = vpop.f32.mrb[53].mxu1 }
0x176e   :  { %v2028_v24 = vpop.f32.mrb[54].mxu1 }
0x176f   :  { %v2035_v25 = vpack.c.bf16 %v2028_v24, %v2025_v22  ;;  %v3547_v26 = vpop.f32.mrb[55].mxu1 }
0x1771   :  { %3551 = vmatmul.mubr.msk.bf16.vlgmr.msra.gmra.mrb[48].mxu0 %vm523_vm6, %v2035_v25 }
0x1772   :  { %3570 = vmatprep.mubr.msk.bf16.mxu0 %vm3863_vm1, %v3862_v1  ;;  %3563 = vmatpush3.bf16.msra.mxu0 %v3660_v7  ;;  %v3166_v7 = vld [vmem:[%s4446_s28 + $0x1] ss:$0 sm:$0xff] }
0x1773   :  { %3564 = vmatprep.subr.bf16.mxu0 %v3862_v1 }
0x1776   :  { %3565 = vmatpush3.bf16.msra.mxu0 %v3661_v34 }
0x1777   :  { %3566 = vmatprep.subr.bf16.mxu0 %v3862_v1 }
0x177a   :  { %3567 = vmatpush3.bf16.msra.mxu0 %v3662_v8 }
0x177b   :  { %3568 = vmatprep.subr.bf16.mxu0 %v3862_v1 }
0x177e   :  { %3569 = vmatpush3.bf16.msra.mxu0 %v3663_v35 }
0x1844   :  { %v2079_v31 = vpop.f32.mrb[48].mxu0 }
0x1845   :  { %v2086_v32 = vadd.f32 %v2079_v31, %v1715_v29  ;;  %v3552_v58 = vpop.f32.mrb[49].mxu0 }
0x1846   :  { %v2082_v36 = vpop.f32.mrb[50].mxu0 }
0x1847   :  { %v2087_v37 = vadd.f32 %v2082_v36, %v1716_v33  ;;  %v3553_v38 = vpop.f32.mrb[51].mxu0  ;;  %v2088_v39 = vadd.f32 %v2086_v32, %v4225_v13 }
0x1849   :  { %v2094_v12 = vsel %vm267_vm5, %v2088_v39, 0.0  ;;  %v2089_v40 = vadd.f32 %v2087_v37, %v4227_v14  ;;  %v3658_v14 = vld [vmem:[%s4440_s9 + $0x10] sm:$0xff]  }
0x184a   :  { %2095 = vadd.xlane.f32.xlu1 %v2094_v12  ;;  %3555 = vmatpush3.bf16.msra.mxu1 %v3658_v14 }
0x184b   :  { %v2097_v55 = vsel %vm267_vm5, %v2089_v40, 0.0  ;;  %3556 = vmatprep.subr.bf16.mxu1 %v3862_v1 }
0x184c   :  { %2098 = vadd.xlane.f32.xlu0 %v2097_v55  ;;  %v3158_v55 = vld [vmem:[%s4445_s29 + $0x1] ss:$0 sm:$0xff] }
0x184e   :  { %3557 = vmatpush3.bf16.msra.mxu1 %v3659_v48 }
0x184f   :  { %3574 = vmatprep.subr.bf16.mxu1 %v3862_v1 }
0x18d7   :  { %v2096_v41 = vpop.xlane.xlu1 %2095 }
0x18d8   :  { %v2100_v56 = vmul.f32 0.03125, %v2096_v41 }
0x18d9   :  { %v2099_v42 = vpop.xlane.xlu0 %2098 }
0x18da   :  { %v2102_v43 = vsub.f32 %v2088_v39, %v2100_v56  ;;  %v2101_v16 = vmul.f32 0.03125, %v2099_v42 }
0x18dc   :  { %v2103_v44 = vsub.f32 %v2089_v40, %v2101_v16  ;;  %v2104_v45 = vmul.f32 %v2102_v43, %v2102_v43 }
0x18de   :  { %v2106_v46 = vsel %vm267_vm5, %v2104_v45, 0.0  ;;  %v2105_v13 = vmul.f32 %v2103_v44, %v2103_v44 }
0x18df   :  { %2107 = vadd.xlane.f32.xlu1 %v2106_v46 }
0x18e0   :  { %v2109_v47 = vsel %vm267_vm5, %v2105_v13, 0.0 }
0x18e1   :  { %2110 = vadd.xlane.f32.xlu0 %v2109_v47 }
0x196c   :  { %v2108_v49 = vpop.xlane.xlu1 %2107 }
0x196d   :  { %v2112_v50 = vmul.f32 0.03125, %v2108_v49 }
0x196e   :  { %v2111_v51 = vpop.xlane.xlu0 %2110 }
0x196f   :  { %v2114_v52 = vadd.f32 1e-12, %v2112_v50  ;;  %v2113_v53 = vmul.f32 0.03125, %v2111_v51 }
0x1971   :  { %3758 = vrsqrt.f32 %v2114_v52  ;;  %v2115_v54 = vadd.f32 1e-12, %v2113_v53 }
0x1973   :  { %3760 = vrsqrt.f32 %v2115_v54 }
0x197b   :  { %v3759_v57 = vpop.eup %3758 }
0x197c   :  { %v2118_v60 = vmul.f32 %v3759_v57, %v2102_v43 }
0x197d   :  { %v3761_v61 = vpop.eup %3760 }
0x197e   :  { %v2126_v62 = vmul.f32 %v3138_v59, %v2118_v60  ;;  %v2119_v63 = vmul.f32 %v3761_v61, %v2103_v44  ;;  %v3664_v60 = vld [vmem:[%s4448_s3] sm:$0xff]   ;;  %v3665_v61 = vld [vmem:[%s4448_s3 + $0x8] sm:$0xff]  }
0x1980   :  { %v2127_v3 = vmul.f32 %v3138_v59, %v2119_v63  ;;  %v2134_v4 = vadd.f32 %v3139_v2, %v2126_v62 }
0x1982   :  { %v2135_v5 = vadd.f32 %v3139_v2, %v2127_v3 }
0x1984   :  { %v2141_v6 = vpack.c.bf16 %v2135_v5, %v2134_v4 }
0x1986   :  { %3559 = vmatmul.mubr.msk.bf16.vlgmr.msra.gmra.mrb[56].mxu1 %vm267_vm5, %v2141_v6 }
0x1987   :  { %3578 = vmatprep.mubr.msk.bf16.mxu1 %vm3863_vm1, %v3862_v1  ;;  %3575 = vmatpush3.bf16.msra.mxu1 %v3664_v60  ;;  %v3703_v60 = vld [vmem:[%s4007_s20 + $0xf0] sm:$0xff]  }
0x1988   :  { %3576 = vmatprep.subr.bf16.mxu1 %v3862_v1 }
0x198b   :  { %3577 = vmatpush3.bf16.msra.mxu1 %v3665_v61  ;;  %v3704_v61 = vld [vmem:[%s4007_s20 + $0x30] sm:$0xff]  }
0x1a59   :  { %v2199_v10 = vpop.f32.mrb[56].mxu1 }
0x1a5a   :  { %v2200_v11 = vadd.f32 %v3145_v9, %v2199_v10  ;;  %v3560_v15 = vpop.f32.mrb[57].mxu1 }
0x1a5b   :  { %v2202_v17 = vpop.f32.mrb[58].mxu1 }
0x1a5c   :  { %v2206_v18 = vmul.f32 %v2200_v11, %v2200_v11  ;;  %v2203_v19 = vadd.f32 %v3145_v9, %v2202_v17  ;;  %v3561_v20 = vpop.f32.mrb[59].mxu1  ;;  %v3167_v9 = vld [vmem:[%s4447_s1 + $0x1] ss:$0 sm:$0xff] }
0x1a5d   :  { %v3669_v20 = vld [vmem:[%s4449_s8 + $0x8] ss:$16 sps:$4 sm:$0xff]  }
0x1a5e   :  { %v2208_v21 = vmul.f32 %v2206_v18, %v2200_v11  ;;  %v2207_v22 = vmul.f32 %v2203_v19, %v2203_v19  ;;  %v3666_v18 = vld [vmem:[%s4449_s8] ss:$16 sps:$4 sm:$0xff]  }
0x1a60   :  { %v2210_v23 = vmul.f32 0.044715, %v2208_v21  ;;  %v2209_v24 = vmul.f32 %v2207_v22, %v2203_v19  ;;  %v3671_v21 = vld [vmem:[%s4449_s8 + $0xc] ss:$16 sps:$4 sm:$0xff]   ;;  %v3674_v22 = vld [vmem:[%s4449_s8 + $0x24] ss:$16 sps:$4 sm:$0xff]  }
0x1a61   :  { %2545 = vmatprep.subr.bf16.mxu0 %v3671_v21 }
0x1a62   :  { %v2212_v25 = vadd.f32 %v2210_v23, %v2200_v11  ;;  %v2211_v26 = vmul.f32 0.044715, %v2209_v24  ;;  %v3677_v23 = vld [vmem:[%s4449_s8 + $0x2c] ss:$16 sps:$4 sm:$0xff]   ;;  %v3672_v24 = vld [vmem:[%s4449_s8 + $0x20] ss:$16 sps:$4 sm:$0xff]  }
0x1a64   :  { %v2214_v28 = vmul.f32 0.7978846, %v2212_v25  ;;  %v2213_v29 = vadd.f32 %v2211_v26, %v2203_v19  ;;  %v3675_v25 = vld [vmem:[%s4449_s8 + $0x28] ss:$16 sps:$4 sm:$0xff]   ;;  %v3679_v26 = vld [vmem:[%s4007_s20 + $0xc0] sm:$0xff]  }
0x1a66   :  { %3762 = vtanh.f32 %v2214_v28  ;;  %v2215_v31 = vmul.f32 0.7978846, %v2213_v29  ;;  %v3168_v28 = vld [vmem:[%s4450_s14] ss:$0 sm:$0xff] }
0x1a68   :  { %3764 = vtanh.f32 %v2215_v31 }
0x1a70   :  { %v3763_v33 = vpop.eup %3762 }
0x1a71   :  { %v2218_v32 = vadd.f32 1.0, %v3763_v33 }
0x1a72   :  { %v3765_v58 = vpop.eup %3764 }
0x1a73   :  { %v2220_v36 = vmul.f32 0.5, %v2218_v32  ;;  %v2219_v37 = vadd.f32 1.0, %v3765_v58 }
0x1a75   :  { %v2221_v38 = vmul.f32 0.5, %v2219_v37  ;;  %v2222_v39 = vmul.f32 %v2220_v36, %v2200_v11 }
0x1a77   :  { %v2223_v12 = vmul.f32 %v2221_v38, %v2203_v19  ;;  %v3668_v19 = vld [vmem:[%s4449_s8 + $0x4] ss:$16 sps:$4 sm:$0xff]  }
0x1a78   :  { %2502 = vmatprep.subr.bf16.mxu1 %v3668_v19 }
0x1a79   :  { %v2233_v40 = vpack.c.bf16 %v2223_v12, %v2222_v39  ;;  %v3680_v39 = vld [vmem:[%s4007_s20] sm:$0xff]  }
0x1a7a   :  { %v3681_v12 = vld [vmem:[%s4007_s20 + $0x80] sm:$0xff]  }
0x1a7b   :  { %3571 = vmatmul.mubr.msk.bf16.vlgmr.msra.gmra.mrb[52].mxu0 %vm1243_vm7, %v2233_v40 }
0x1a7c   :  { %2577 = vmatprep.mubr.bf16.mxu0 %v3861_v0  ;;  %2546 = vmatpush1.bf16.msra.mxu0 %v3669_v20 }
0x1a7d   :  { %2547 = vmatprep.subr.bf16.mxu0 %v3677_v23 }
0x1a80   :  { %2548 = vmatpush1.bf16.msra.mxu0 %v3675_v25 }
0x1a81   :  { %3326 = vmatprep.subr.bf16.mxu0 %v3679_v26 }
0x1b4e   :  { %v2303_v41 = vpop.f32.mrb[52].mxu0 }
0x1b4f   :  { %v2304_v56 = vadd.f32 %v3158_v55, %v2303_v41  ;;  %v3572_v42 = vpop.f32.mrb[53].mxu0  ;;  %v3683_v41 = vld [vmem:[%s4007_s20 + $0xc8] sm:$0xff]  }
0x1b50   :  { %v2306_v43 = vpop.f32.mrb[54].mxu0  ;;  %v3685_v42 = vld [vmem:[%s4007_s20 + $0x88] sm:$0xff]  }
0x1b51   :  { %v2307_v16 = vadd.f32 %v3158_v55, %v2306_v43  ;;  %v3573_v44 = vpop.f32.mrb[55].mxu0  ;;  %v2310_v45 = vadd.f32 %v2304_v56, %v2134_v4  ;;  %v3682_v55 = vld [vmem:[%s4007_s20 + $0x48] sm:$0xff]   ;;  %v3686_v43 = vld [vmem:[%s4007_s20 + $0x50] sm:$0xff]  }
0x1b52   :  { %v3684_v56 = vld [vmem:[%s4007_s20 + $0x8] sm:$0xff]   ;;  %v3688_v44 = vld [vmem:[%s4007_s20 + $0x10] sm:$0xff]  }
0x1b53   :  { %v2316_v46 = vsel %vm267_vm5, %v2310_v45, 0.0  ;;  %v2311_v13 = vadd.f32 %v2307_v16, %v2135_v5  ;;  %v3687_v16 = vld [vmem:[%s4007_s20 + $0xd0] sm:$0xff]  }
0x1b54   :  { %2317 = vadd.xlane.f32.xlu1 %v2316_v46  ;;  %v3690_v46 = vld [vmem:[%s4007_s20 + $0x58] sm:$0xff]  }
0x1b55   :  { %v2319_v47 = vsel %vm267_vm5, %v2311_v13, 0.0 }
0x1b56   :  { %2320 = vadd.xlane.f32.xlu0 %v2319_v47  ;;  %v3692_v47 = vld [vmem:[%s4007_s20 + $0x18] sm:$0xff]  }
0x1be1   :  { %v2318_v14 = vpop.xlane.xlu1 %2317 }
0x1be2   :  { %v2322_v48 = vmul.f32 0.03125, %v2318_v14  ;;  %v3693_v14 = vld [vmem:[%s4007_s20 + $0x98] sm:$0xff]  }
0x1be3   :  { %v2321_v49 = vpop.xlane.xlu0 %2320 }
0x1be4   :  { %v2324_v50 = vsub.f32 %v2310_v45, %v2322_v48  ;;  %v2323_v51 = vmul.f32 0.03125, %v2321_v49  ;;  %v3689_v45 = vld [vmem:[%s4007_s20 + $0x90] sm:$0xff]   ;;  %v3694_v48 = vld [vmem:[%s4007_s20 + $0x60] sm:$0xff]  }
0x1be5   :  { %v3695_v49 = vld [vmem:[%s4007_s20 + $0xe0] sm:$0xff]  }
0x1be6   :  { %v2325_v52 = vsub.f32 %v2311_v13, %v2323_v51  ;;  %v2326_v53 = vmul.f32 %v2324_v50, %v2324_v50  ;;  %v3691_v13 = vld [vmem:[%s4007_s20 + $0xd8] sm:$0xff]   ;;  %v3697_v51 = vld [vmem:[%s4007_s20 + $0xa0] sm:$0xff]  }
0x1be8   :  { %v2328_v54 = vsel %vm267_vm5, %v2326_v53, 0.0  ;;  %v2327_v57 = vmul.f32 %v2325_v52, %v2325_v52  ;;  %v3699_v53 = vld [vmem:[%s4007_s20 + $0xe8] sm:$0xff]  }
0x1be9   :  { %2329 = vadd.xlane.f32.xlu1 %v2328_v54  ;;  %v3700_v54 = vld [vmem:[%s4007_s20 + $0x28] sm:$0xff]  }
0x1bea   :  { %v2331_v59 = vsel %vm267_vm5, %v2327_v57, 0.0  ;;  %v3701_v57 = vld [vmem:[%s4007_s20 + $0xa8] sm:$0xff]  }
0x1beb   :  { %2332 = vadd.xlane.f32.xlu0 %v2331_v59  ;;  %v3702_v59 = vld [vmem:[%s4007_s20 + $0x70] sm:$0xff]  }
0x1c76   :  { %v2330_v62 = vpop.xlane.xlu1 %2329 }
0x1c77   :  { %v2334_v63 = vmul.f32 0.03125, %v2330_v62  ;;  %v3705_v62 = vld [vmem:[%s4007_s20 + $0xb0] sm:$0xff]  }
0x1c78   :  { %v2333_v2 = vpop.xlane.xlu0 %2332 }
0x1c79   :  { %v2336_v3 = vadd.f32 1e-12, %v2334_v63  ;;  %v2335_v4 = vmul.f32 0.03125, %v2333_v2  ;;  %v3706_v63 = vld [vmem:[%s4007_s20 + $0x78] sm:$0xff]  }
0x1c7a   :  { %v3707_v2 = vld [vmem:[%s4007_s20 + $0xf8] sm:$0xff]  }
0x1c7b   :  { %3766 = vrsqrt.f32 %v2336_v3  ;;  %v2337_v5 = vadd.f32 1e-12, %v2335_v4  ;;  %v3708_v3 = vld [vmem:[%s4007_s20 + $0x38] sm:$0xff]  }
0x1c7c   :  { %v3709_v4 = vld [vmem:[%s4007_s20 + $0xb8] sm:$0xff]  }
0x1c7d   :  { %3768 = vrsqrt.f32 %v2337_v5  ;;  %v2449_v5 = vsub.s32 2, %v4104_v27 }
0x1c85   :  { %v3767_v6 = vpop.eup %3766 }
0x1c86   :  { %v2340_v34 = vmul.f32 %v3767_v6, %v2324_v50  ;;  %v3696_v50 = vld [vmem:[%s4007_s20 + $0x20] sm:$0xff]  }
0x1c87   :  { %v3769_v1 = vpop.eup %3768  ;;  %v2437_v6 = vld [vmem:[%s4002_s12] sm:$0xf] }
0x1c88   :  { %v2348_v8 = vmul.f32 %v3166_v7, %v2340_v34  ;;  %v2341_v35 = vmul.f32 %v3769_v1, %v2325_v52  ;;  %v3698_v52 = vld [vmem:[%s4007_s20 + $0x68] sm:$0xff]   ;;  %v2453_v34 = vsub.s32 3, %v4104_v27  ;;  %v2442_v1 = vrot.slane %v2437_v6, %v319_v30 }
0x1c8a   :  { %v2349_v10 = vmul.f32 %v3166_v7, %v2341_v35  ;;  %v2356_v11 = vadd.f32 %v3167_v9, %v2348_v8  ;;  %v2445_v7 = vsub.s32 1, %v4104_v27  ;;  %v2450_v8 = vrot.slane %v2437_v6, %v2449_v5 }
0x1c8c   :  { %v2357_v15 = vadd.f32 %v3167_v9, %v2349_v10  ;;  %v2446_v35 = vrot.slane %v2437_v6, %v2445_v7  ;;  %v2454_v9 = vrot.slane %v2437_v6, %v2453_v34 }
0x1c8e   :  { %v2362_v17 = vpack.c.bf16 %v2357_v15, %v2356_v11 }
0x1c90   :  { %3579 = vmatmul.mubr.msk.bf16.vlgmr.msra.gmra.mrb[60].mxu1 %vm267_vm5, %v2362_v17 }
0x1c91   :  { %2534 = vmatprep.mubr.bf16.mxu1 %v3861_v0  ;;  %2503 = vmatpush1.bf16.msra.mxu1 %v3666_v18  ;;  %v3678_v0 = vld [vmem:[%s4007_s20 + $0x40] sm:$0xff]  }
0x1c92   :  { %2504 = vmatprep.subr.bf16.mxu1 %v3674_v22 }
0x1c95   :  { %2505 = vmatpush1.bf16.msra.mxu1 %v3672_v24 }
0x1c96   :  { %3304 = vmatprep.subr.bf16.mxu1 %v3678_v0 }
0x1d63   :  { %v2419_v29 = vpop.f32.mrb[60].mxu1 }
0x1d64   :  { %v2420_v31 = vadd.f32 %v3168_v28, %v2419_v29  ;;  %v3580_v33 = vpop.f32.mrb[61].mxu1 }
0x1d65   :  { %v2422_v32 = vpop.f32.mrb[62].mxu1 }
0x1d66   :  { %v2423_v58 = vadd.f32 %v3168_v28, %v2422_v32  ;;  %v3581_v36 = vpop.f32.mrb[63].mxu1  ;;  %3770 = vtanh.f32 %v2420_v31 }
0x1d68   :  { %3772 = vtanh.f32 %v2423_v58 }
0x1d70   :  { %v3771_v37 = vpop.eup %3770 }
0x1d72   :  { %v3773_v38 = vpop.eup %3772 }
0x1d73   :  { %v2436_v40 = vpack.c.bf16 %v3773_v38, %v3771_v37 }
0x1d75   :  { %3180 = vmatmul.mubr.msk.bf16.vlgmr.msra.gmra.mrb[64].mxu1 %vm267_vm5, %v2436_v40  ;;  %3181 = vmatmul.mubr.msk.bf16.vlgmr.msra.gmra.mrb[56].mxu0 %vm267_vm5, %v2436_v40 }
0x1d76   :  { %3305 = vmatpush3.bf16.msra.mxu1 %v3680_v39  ;;  %3327 = vmatpush3.bf16.msra.mxu0 %v3681_v12 }
0x1d77   :  { %3306 = vmatprep.subr.bf16.mxu1 %v3682_v55  ;;  %3328 = vmatprep.subr.bf16.mxu0 %v3683_v41 }
0x1d7a   :  { %3307 = vmatpush3.bf16.msra.mxu1 %v3684_v56  ;;  %3329 = vmatpush3.bf16.msra.mxu0 %v3685_v42  ;;  %v3182_v56 = vld [vmem:[%s4012_s27] ss:$0 sm:$0xff] }
0x1d7b   :  { %3308 = vmatprep.subr.bf16.mxu1 %v3686_v43  ;;  %3330 = vmatprep.subr.bf16.mxu0 %v3687_v16 }
0x1d7e   :  { %3309 = vmatpush3.bf16.msra.mxu1 %v3688_v44  ;;  %3331 = vmatpush3.bf16.msra.mxu0 %v3689_v45 }
0x1d7f   :  { %3310 = vmatprep.subr.bf16.mxu1 %v3690_v46  ;;  %3332 = vmatprep.subr.bf16.mxu0 %v3691_v13 }
0x1d82   :  { %3311 = vmatpush3.bf16.msra.mxu1 %v3692_v47  ;;  %3333 = vmatpush3.bf16.msra.mxu0 %v3693_v14 }
0x1d83   :  { %3312 = vmatprep.subr.bf16.mxu1 %v3694_v48  ;;  %3334 = vmatprep.subr.bf16.mxu0 %v3695_v49 }
0x1d86   :  { %3313 = vmatpush3.bf16.msra.mxu1 %v3696_v50  ;;  %3335 = vmatpush3.bf16.msra.mxu0 %v3697_v51 }
0x1d87   :  { %3314 = vmatprep.subr.bf16.mxu1 %v3698_v52  ;;  %3336 = vmatprep.subr.bf16.mxu0 %v3699_v53 }
0x1d8a   :  { %3315 = vmatpush3.bf16.msra.mxu1 %v3700_v54  ;;  %3337 = vmatpush3.bf16.msra.mxu0 %v3701_v57 }
0x1d8b   :  { %3316 = vmatprep.subr.bf16.mxu1 %v3702_v59  ;;  %3338 = vmatprep.subr.bf16.mxu0 %v3703_v60 }
0x1d8e   :  { %3317 = vmatpush3.bf16.msra.mxu1 %v3704_v61  ;;  %3339 = vmatpush3.bf16.msra.mxu0 %v3705_v62 }
0x1d8f   :  { %3318 = vmatprep.subr.bf16.mxu1 %v3706_v63  ;;  %3340 = vmatprep.subr.bf16.mxu0 %v3707_v2 }
0x1d92   :  { %3319 = vmatpush3.bf16.msra.mxu1 %v3708_v3  ;;  %3341 = vmatpush3.bf16.msra.mxu0 %v3709_v4 }
0x1e48   :  { %v2536_v10 = vpop.f32.mrb[64].mxu1  ;;  %v2579_v11 = vpop.f32.mrb[56].mxu0 }
0x1e49   :  { %v2537_v15 = vadd.f32 %v2536_v10, %v2442_v1  ;;  %v2580_v17 = vadd.f32 %v2579_v11, %v2450_v8  ;;  %v2538_v18 = vpop.f32.mrb[65].mxu1  ;;  %v2581_v19 = vpop.f32.mrb[57].mxu0 }
0x1e4a   :  { %v2539_v20 = vadd.f32 %v2538_v18, %v2446_v35  ;;  %v2582_v21 = vadd.f32 %v2581_v19, %v2454_v9  ;;  %v2540_v22 = vpop.f32.mrb[66].mxu1  ;;  %v2583_v23 = vpop.f32.mrb[58].mxu0 }
0x1e4b   :  { %v2541_v24 = vadd.f32 %v2540_v22, %v2442_v1  ;;  %v2584_v25 = vadd.f32 %v2583_v23, %v2450_v8  ;;  %v2542_v0 = vpop.f32.mrb[67].mxu1  ;;  %v2585_v26 = vpop.f32.mrb[59].mxu0  ;;  %v2588_v30 = vmax.f32 %v2537_v15, 0.0  ;;  %v2590_v29 = vmax.f32 %v2580_v17, 0.0 }
0x1e4c   :  { %v2543_v28 = vadd.f32 %v2542_v0, %v2446_v35  ;;  %v2586_v27 = vadd.f32 %v2585_v26, %v2454_v9  ;;  %v2589_v32 = vmax.f32 %v2539_v20, 0.0  ;;  %v2591_v58 = vmax.f32 %v2582_v21, 0.0 }
0x1e4d   :  { %v2592_v31 = vmax.f32 %v2541_v24, 0.0  ;;  %v2594_v33 = vmax.f32 %v2584_v25, 0.0 }
0x1e4e   :  { %v2593_v36 = vmax.f32 %v2543_v28, 0.0  ;;  %v2595_v37 = vmax.f32 %v2586_v27, 0.0 }
0x1e4f   :  { %v2660_v38 = vpack.c.bf16 %v2592_v31, %v2588_v30  ;;  %v2662_v39 = vpack.c.bf16 %v2594_v33, %v2590_v29 }
0x1e50   :  { %v2661_v12 = vpack.c.bf16 %v2593_v36, %v2589_v32  ;;  %v2663_v40 = vpack.c.bf16 %v2595_v37, %v2591_v58 }
0x1e52   :  { %2895 = vmatprep.mubr.bf16.mxu1 %v2661_v12  ;;  %2936 = vmatprep.mubr.bf16.mxu0 %v2663_v40 }
0x1e53   :  { %2896 = vmatmul.mubr.bf16.vlgmr.msra.gmra.mrb[68].mxu1 %v2660_v38  ;;  %2937 = vmatmul.mubr.bf16.vlgmr.msra.gmra.mrb[60].mxu0 %v2662_v39 }
0x1f26   :  { %v3320_v55 = vpop.f32.mrb[68].mxu1  ;;  %v3342_v41 = vpop.f32.mrb[60].mxu0 }
0x1f27   :  { %v3321_v42 = vpop.f32.mrb[69].mxu1  ;;  %v3343_v43 = vpop.f32.mrb[61].mxu0 }
0x1f28   :  { %v3322_v16 = vadd.f32 %v3321_v42, %v3320_v55  ;;  %v3344_v44 = vadd.f32 %v3343_v43, %v3342_v41  ;;  %v3323_v45 = vpop.f32.mrb[70].mxu1  ;;  %v3345_v46 = vpop.f32.mrb[62].mxu0 }
0x1f29   :  { %v3324_v13 = vpop.f32.mrb[71].mxu1  ;;  %v3346_v47 = vpop.f32.mrb[63].mxu0 }
0x1f2a   :  { %v2898_v14 = vadd.f32 %v3322_v16, %v3182_v56  ;;  %v3325_v48 = vadd.f32 %v3324_v13, %v3323_v45  ;;  %v3347_v49 = vadd.f32 %v3346_v47, %v3345_v46 }
0x1f2c   :  { %v2939_v50 = vadd.f32 %v3344_v44, %v2898_v14  ;;  %v2901_v51 = vadd.f32 %v3325_v48, %v3182_v56 }
0x1f2e   :  { %v3215_v52 = vmul.f32 -1.442695, %v2939_v50  ;;  %v2942_v53 = vadd.f32 %v3347_v49, %v2901_v51 }
0x1f30   :  { %3774 = vpow2.f32 %v3215_v52  ;;  %v3216_v54 = vmul.f32 -1.442695, %v2942_v53 }
0x1f32   :  { %3776 = vpow2.f32 %v3216_v54 }
0x1f3a   :  { %v3775_v57 = vpop.eup %3774 }
0x1f3b   :  { %v2951_v59 = vadd.f32 1.0, %v3775_v57 }
0x1f3c   :  { %v3777_v60 = vpop.eup %3776 }
0x1f3d   :  { %3778 = vrcp.f32 %v2951_v59  ;;  %v2952_v61 = vadd.f32 1.0, %v3777_v60 }
0x1f3f   :  { %3780 = vrcp.f32 %v2952_v61 }
0x1f47   :  { %v3779_v62 = vpop.eup %3778 }
0x1f48   :  { %2957 = vst [vmem:[%s4017_s4] sm:$0xff] %v3779_v62 }
0x1f49   :  { %v3781_v63 = vpop.eup %3780 }
0x1f4a   :  { %2958 = vst [vmem:[%s4017_s4 + $0x8] sm:$0xff] %v3781_v63 }
0x1f4b   :  { %2963 = vsyncpa [#allocation3], 1 }
0x1f4c   :  { %2964 = vsyncpa [#allocation5], 1 }

</bundles_post_ra>
